<compile_context>
chip_gen: v7x
topology: tpu7x:2x2x1
jax: 0.10.0
libtpu: 0.0.40
codegen_flags: <defaults>
</compile_context>

<pallas_src>
from functools import partial

import jax
import jax.numpy as jnp
from jax import lax
from jax.experimental import pallas as pl
from jax.experimental.pallas import tpu as pltpu

EPS = 1e-5  # nn.BatchNorm1d default eps


# ------------------------------ fused forward kernel --------------------------------
def _fused_kernel(x_ref, m1_ref, bn_ref, p_ref, wih_ref, bl_ref, b2_ref,
                  whh_hbm, m2_hbm, o_ref,
                  whh_vmem, m2_vmem, sem, *, seq_len, batch):
    f32 = jnp.float32
    NH = wih_ref.shape[0]          # num_nodes * hidden_dim

    # Kick off DMA of the late-use weights (recurrent weight + stage-3 matrix) so the
    # HBM->VMEM transfer overlaps stage-1 / BN / input-projection compute.
    whh_cp = pltpu.make_async_copy(whh_hbm, whh_vmem, sem.at[0])
    m2_cp = pltpu.make_async_copy(m2_hbm, m2_vmem, sem.at[1])
    whh_cp.start()
    m2_cp.start()

    # ---- stage 1: GraphSAGE-1.  (adj @ x) @ W1 + b1  ==  x @ kron(adj.T, W1) + b1 ----
    y = jnp.dot(x_ref[...], m1_ref[...], preferred_element_type=f32) + bn_ref[0:1, :]
    # y: (S*B, N*H)

    # ---- BatchNorm1d(num_nodes): training-mode batch stats (fused), then ReLU ----
    # sum(y) and sum(y*y) projected with ONE (2,NH)@(NH,NH) matmul (per-node block
    # averaging, result already lane-broadcast); var = E[y^2] - mean^2 (biased).
    s1 = jnp.sum(y, axis=0, keepdims=True)
    s2 = jnp.sum(y * y, axis=0, keepdims=True)
    proj = jnp.dot(jnp.concatenate([s1, s2], axis=0), p_ref[...],
                   preferred_element_type=f32)                          # (2, N*H)
    mean = proj[0:1, :]
    var = proj[1:2, :] - mean * mean
    h1 = (y - mean) * lax.rsqrt(var + EPS) * bn_ref[1:2, :] + bn_ref[2:3, :]
    h1 = jnp.maximum(h1, 0.0)                                           # (S*B, N*H)

    # ---- LSTM: input projection hoisted out of the recurrence (one big matmul).
    # Kept 2-D time-major (row t*B + b); static row slices per step -> no relayout.
    gates_x = jnp.dot(h1, wih_ref[...], preferred_element_type=f32) + bl_ref[...]

    whh_cp.wait()   # recurrent weight must be resident before the serial chain starts

    h_prev = jnp.zeros((batch, NH), f32)
    c_prev = jnp.zeros((batch, NH), f32)
    hs = []
    for t in range(seq_len):       # static trip count -> fully unrolled straight-line code
        g = gates_x[t * batch:(t + 1) * batch, :] + jnp.dot(
            h_prev, whh_vmem[...], preferred_element_type=f32)
        i = jax.nn.sigmoid(g[:, 0 * NH:1 * NH])        # PyTorch gate order: i, f, g, o
        f = jax.nn.sigmoid(g[:, 1 * NH:2 * NH])
        gg = jnp.tanh(g[:, 2 * NH:3 * NH])
        o = jax.nn.sigmoid(g[:, 3 * NH:4 * NH])
        c_prev = f * c_prev + i * gg
        h_prev = o * jnp.tanh(c_prev)
        hs.append(h_prev)
    # Tiny hidden history (S*B x NH f32 = 2 vregs) carried as values; no padded scratch.
    h_all = jnp.concatenate(hs, axis=0)                # (S*B, N*H), rows t*B + b

    m2_cp.wait()
    # ---- stage 3: GraphSAGE-2 (lane-padded to 128 output lanes -> unmasked stores) ----
    o_ref[...] = (jnp.dot(h_all, m2_vmem[...], preferred_element_type=f32)
                  + b2_ref[...])


# ------------------------------------- wrapper --------------------------------------
def gnn_route_planning_forward(x, adj, params):
    B, S, N, Din = x.shape
    H = params["w1"].shape[1]
    O = params["w2"].shape[1]
    SB, NH, ND, NO = S * B, N * H, N * Din, N * O
    NO_pad = ((NO + 127) // 128) * 128          # lane-dense output width
    f32 = jnp.float32

    adj_t = adj.astype(f32).T

    # activations: rows = s*B + b (time-major), lanes = node-major features
    x_l = x.astype(f32).transpose(1, 0, 2, 3).reshape(SB, ND)

    # fold the "adj @ x" aggregation + Linear of each GraphSAGE stage into one matrix
    m1 = jnp.kron(adj_t, params["w1"].astype(f32))                      # (N*Din, N*H)
    m2 = jnp.kron(adj_t, params["w2"].astype(f32))                      # (N*H,  N*O)
    m2_pad = jnp.zeros((NH, NO_pad), f32).at[:, :NO].set(m2)
    b2_pad = jnp.zeros((1, NO_pad), f32).at[0, :NO].set(
        jnp.tile(params["b2"].astype(f32), N))

    # BatchNorm: per-node block-averaging projector + lane-expanded affine params,
    # stacked with the stage-1 bias into one (3, NH) slab (fewer tiny input DMAs).
    p = jnp.kron(jnp.eye(N, dtype=f32), jnp.ones((H, H), f32)) / (SB * H)   # (N*H, N*H)
    bn_slab = jnp.stack([
        jnp.tile(params["b1"].astype(f32), N),        # row 0: sage1 bias  (lane layout)
        jnp.repeat(params["gamma"].astype(f32), H),   # row 1: bn gamma
        jnp.repeat(params["beta"].astype(f32), H),    # row 2: bn beta
    ], axis=0)

    # Weights stay f32: bf16 MXU weights (the main v6e/v7x throughput lever) would not
    # hold the 2e-4 tolerance vs the f32 reference at NH=128 dot lengths.
    # TODO(synk): with grid=() this uses 1 of v7x's 2 TensorCores; only worth a
    # core_map/batch-grid split (with cross-core BN-stat exchange) if B grows.
    vm = pl.BlockSpec(memory_space=pltpu.MemorySpace.VMEM)
    hbm = pl.BlockSpec(memory_space=pl.ANY)

    cost = pl.CostEstimate(flops=5_000_000, transcendentals=11_000,
                           bytes_accessed=700_000)

    out_l = pl.pallas_call(
        partial(_fused_kernel, seq_len=S, batch=B),
        out_shape=jax.ShapeDtypeStruct((SB, NO_pad), f32),
        in_specs=[vm, vm, vm, vm, vm, vm, vm, hbm, hbm],
        out_specs=vm,
        scratch_shapes=[pltpu.VMEM((NH, 4 * NH), f32),          # whh landing buffer
                        pltpu.VMEM((NH, NO_pad), f32),          # m2 landing buffer
                        pltpu.SemaphoreType.DMA((2,))],
        cost_estimate=cost,
    )(x_l, m1, bn_slab, p,
      params["wih_t"].astype(f32),
      params["b_lstm"].astype(f32).reshape(1, 4 * NH),
      b2_pad,
      params["whh_t"].astype(f32),   # manual DMA (pl.ANY)
      m2_pad)                        # manual DMA (pl.ANY)

    # rows are (s, b); drop the lane padding and restore (B, S, N, O)
    return out_l[:, :NO].reshape(S, B, N, O).transpose(1, 0, 2, 3)


# ------------------------------ deterministic parameters -----------------------------
def init_params(key, num_nodes, input_dim, hidden_dim, output_dim):
    NH = num_nodes * hidden_dim
    ks = jax.random.split(key, 8)

    def u(k, shape, fan_in):
        bound = 1.0 / float(fan_in) ** 0.5
        return jax.random.uniform(k, shape, jnp.float32, -bound, bound)

    return dict(
        w1=u(ks[0], (input_dim, hidden_dim), input_dim),      # sage1.fc.weight.T
        b1=u(ks[1], (hidden_dim,), input_dim),
        gamma=jnp.ones((num_nodes,), jnp.float32),            # bn1.weight
        beta=jnp.zeros((num_nodes,), jnp.float32),            # bn1.bias
        wih_t=u(ks[2], (NH, 4 * NH), NH),                     # rnn.weight_ih_l0.T
        whh_t=u(ks[3], (NH, 4 * NH), NH),                     # rnn.weight_hh_l0.T
        b_lstm=u(ks[4], (4 * NH,), NH) + u(ks[5], (4 * NH,), NH),  # b_ih + b_hh
        w2=u(ks[6], (hidden_dim, output_dim), hidden_dim),    # sage2.fc.weight.T
        b2=u(ks[7], (output_dim,), hidden_dim),
    )


# -------------------------------- pure-JAX reference ---------------------------------
def reference_forward(x, adj, params):
    B, S, N, Din = x.shape
    H = params["w1"].shape[1]
    O = params["w2"].shape[1]
    BS, NH = B * S, N * H
    x3 = x.reshape(BS, N, Din)
    ax = jnp.einsum("nm,bmd->bnd", adj, x3)
    y = ax @ params["w1"] + params["b1"]
    mean = y.mean(axis=(0, 2), keepdims=True)
    var = ((y - mean) ** 2).mean(axis=(0, 2), keepdims=True)
    yn = (y - mean) / jnp.sqrt(var + EPS)
    yn = yn * params["gamma"][None, :, None] + params["beta"][None, :, None]
    h = jnp.maximum(yn, 0.0).reshape(B, S, NH)

    wih, whh, b = params["wih_t"], params["whh_t"], params["b_lstm"]

    def step(carry, xt):
        hp, cp = carry
        gates = xt @ wih + hp @ whh + b
        i = jax.nn.sigmoid(gates[:, :NH])
        f = jax.nn.sigmoid(gates[:, NH:2 * NH])
        g = jnp.tanh(gates[:, 2 * NH:3 * NH])
        o = jax.nn.sigmoid(gates[:, 3 * NH:])
        c = f * cp + i * g
        hn = o * jnp.tanh(c)
        return (hn, c), hn

    init = (jnp.zeros((B, NH), jnp.float32), jnp.zeros((B, NH), jnp.float32))
    _, hseq = lax.scan(step, init, h.transpose(1, 0, 2))
    h2 = hseq.transpose(1, 0, 2).reshape(BS, N, H)
    ah = jnp.einsum("nm,bmh->bnh", adj, h2)
    out = ah @ params["w2"] + params["b2"]
    return out.reshape(B, S, N, O)


if __name__ == "__main__":
    B, S, N, Din, H, O = 2, 8, 8, 4, 16, 4   # num_nodes=8, input_dim=4, hidden_dim=16, output_dim=4
    key = jax.random.PRNGKey(0)
    kx, kadj, kp = jax.random.split(key, 3)
    x = jax.random.normal(kx, (B, S, N, Din), jnp.float32)
    adj = jax.random.uniform(kadj, (N, N), jnp.float32)
    adj = adj / adj.sum(axis=-1, keepdims=True)  # row-normalized adjacency
    params = init_params(kp, N, Din, H, O)

    out = jax.jit(gnn_route_planning_forward)(x, adj, params)
    out = jax.block_until_ready(out)
    assert out.shape == (B, S, N, O)

    ref = reference_forward(x, adj, params)
    if not jnp.allclose(out, ref, rtol=2e-4, atol=2e-4):
        raise AssertionError(
            "mismatch vs reference, max abs diff = %g" % float(jnp.max(jnp.abs(out - ref))))
    print("KERNEL_OK")
</pallas_src>

<mosaic_0001>
module attributes {stable_mosaic.version = 11 : i64} {
  func.func @_fused_kernel(%arg0: memref<16x32xf32, #tpu.memory_space<vmem>>, %arg1: memref<32x128xf32, #tpu.memory_space<vmem>>, %arg2: memref<3x128xf32, #tpu.memory_space<vmem>>, %arg3: memref<128x128xf32, #tpu.memory_space<vmem>>, %arg4: memref<128x512xf32, #tpu.memory_space<vmem>>, %arg5: memref<1x512xf32, #tpu.memory_space<vmem>>, %arg6: memref<1x128xf32, #tpu.memory_space<vmem>>, %arg7: memref<128x512xf32, #tpu.memory_space<any>>, %arg8: memref<128x128xf32, #tpu.memory_space<any>>, %arg9: memref<16x128xf32, #tpu.memory_space<vmem>>, %arg10: memref<128x512xf32, #tpu.memory_space<vmem>>, %arg11: memref<128x128xf32, #tpu.memory_space<vmem>>, %arg12: memref<2x!tpu.dma_semaphore, #tpu.memory_space<semaphore_mem>>) attributes {dimension_semantics = [], scalar_prefetch = 0 : i64, scratch_operands = 3 : i64, tpu.core_type = #tpu.core_type<tc>} {
    %c0_i32 = arith.constant 0 : i32
    %0 = tpu.memref_slice %arg12[%c0_i32] : memref<2x!tpu.dma_semaphore, #tpu.memory_space<semaphore_mem>> -> memref<1x!tpu.dma_semaphore, #tpu.memory_space<semaphore_mem>>
    %1 = tpu.memref_squeeze %0 : memref<1x!tpu.dma_semaphore, #tpu.memory_space<semaphore_mem>> -> memref<!tpu.dma_semaphore, #tpu.memory_space<semaphore_mem>>
    tpu.enqueue_dma source(%arg7 : memref<128x512xf32, #tpu.memory_space<any>>) target(%arg10 : memref<128x512xf32, #tpu.memory_space<vmem>>) target_semaphore(%1 : memref<!tpu.dma_semaphore, #tpu.memory_space<semaphore_mem>>)
    %c1_i32 = arith.constant 1 : i32
    %2 = tpu.memref_slice %arg12[%c1_i32] : memref<2x!tpu.dma_semaphore, #tpu.memory_space<semaphore_mem>> -> memref<1x!tpu.dma_semaphore, #tpu.memory_space<semaphore_mem>>
    %3 = tpu.memref_squeeze %2 : memref<1x!tpu.dma_semaphore, #tpu.memory_space<semaphore_mem>> -> memref<!tpu.dma_semaphore, #tpu.memory_space<semaphore_mem>>
    tpu.enqueue_dma source(%arg8 : memref<128x128xf32, #tpu.memory_space<any>>) target(%arg11 : memref<128x128xf32, #tpu.memory_space<vmem>>) target_semaphore(%3 : memref<!tpu.dma_semaphore, #tpu.memory_space<semaphore_mem>>)
    %c0 = arith.constant 0 : index
    %c0_0 = arith.constant 0 : index
    %4 = vector.load %arg0[%c0, %c0_0] : memref<16x32xf32, #tpu.memory_space<vmem>>, vector<16x32xf32>
    %c0_1 = arith.constant 0 : index
    %c0_2 = arith.constant 0 : index
    %5 = vector.load %arg1[%c0_1, %c0_2] : memref<32x128xf32, #tpu.memory_space<vmem>>, vector<32x128xf32>
    %cst = arith.constant dense<0.000000e+00> : vector<16x128xf32>
    %6 = tpu.matmul %4, %5, %cst {dimension_numbers = #tpu.dot_dimension_numbers<[1], [0], [0], [1], [0, 0, 1, 1], [], []>} : vector<16x32xf32>, vector<32x128xf32>, vector<16x128xf32> -> vector<16x128xf32>
    %c0_3 = arith.constant 0 : index
    %c0_4 = arith.constant 0 : index
    %7 = vector.load %arg2[%c0_3, %c0_4] : memref<3x128xf32, #tpu.memory_space<vmem>>, vector<1x128xf32>
    %8 = vector.broadcast %7 : vector<1x128xf32> to vector<16x128xf32>
    %9 = arith.addf %6, %8 : vector<16x128xf32>
    %cst_5 = arith.constant dense<0.000000e+00> : vector<128xf32>
    %10 = vector.multi_reduction <add>, %9, %cst_5 [0] : vector<16x128xf32> to vector<128xf32>
    %11 = vector.shape_cast %10 : vector<128xf32> to vector<1x128xf32>
    %12 = arith.mulf %9, %9 : vector<16x128xf32>
    %cst_6 = arith.constant dense<0.000000e+00> : vector<128xf32>
    %13 = vector.multi_reduction <add>, %12, %cst_6 [0] : vector<16x128xf32> to vector<128xf32>
    %14 = vector.shape_cast %13 : vector<128xf32> to vector<1x128xf32>
    %15 = tpu.concatenate %11, %14 in 0 : vector<1x128xf32>, vector<1x128xf32> -> vector<2x128xf32>
    %c0_7 = arith.constant 0 : index
    %c0_8 = arith.constant 0 : index
    %16 = vector.load %arg3[%c0_7, %c0_8] : memref<128x128xf32, #tpu.memory_space<vmem>>, vector<128x128xf32>
    %cst_9 = arith.constant dense<0.000000e+00> : vector<2x128xf32>
    %17 = tpu.matmul %15, %16, %cst_9 {dimension_numbers = #tpu.dot_dimension_numbers<[1], [0], [0], [1], [0, 0, 1, 1], [], []>} : vector<2x128xf32>, vector<128x128xf32>, vector<2x128xf32> -> vector<2x128xf32>
    %18 = vector.extract_strided_slice %17 {offsets = [0, 0], sizes = [1, 128], strides = [1, 1]} : vector<2x128xf32> to vector<1x128xf32>
    %19 = vector.extract_strided_slice %17 {offsets = [1, 0], sizes = [1, 128], strides = [1, 1]} : vector<2x128xf32> to vector<1x128xf32>
    %20 = arith.mulf %18, %18 : vector<1x128xf32>
    %21 = arith.subf %19, %20 : vector<1x128xf32>
    %22 = vector.broadcast %18 : vector<1x128xf32> to vector<16x128xf32>
    %23 = arith.subf %9, %22 : vector<16x128xf32>
    %cst_10 = arith.constant 9.99999974E-6 : f32
    %24 = vector.broadcast %cst_10 : f32 to vector<1x128xf32>
    %25 = arith.addf %21, %24 : vector<1x128xf32>
    %26 = math.rsqrt %25 : vector<1x128xf32>
    %27 = vector.broadcast %26 : vector<1x128xf32> to vector<16x128xf32>
    %28 = arith.mulf %23, %27 : vector<16x128xf32>
    %c1 = arith.constant 1 : index
    %c0_11 = arith.constant 0 : index
    %29 = vector.load %arg2[%c1, %c0_11] : memref<3x128xf32, #tpu.memory_space<vmem>>, vector<1x128xf32>
    %30 = vector.broadcast %29 : vector<1x128xf32> to vector<16x128xf32>
    %31 = arith.mulf %28, %30 : vector<16x128xf32>
    %c2 = arith.constant 2 : index
    %c0_12 = arith.constant 0 : index
    %32 = vector.load %arg2[%c2, %c0_12] : memref<3x128xf32, #tpu.memory_space<vmem>>, vector<1x128xf32>
    %33 = vector.broadcast %32 : vector<1x128xf32> to vector<16x128xf32>
    %34 = arith.addf %31, %33 : vector<16x128xf32>
    %cst_13 = arith.constant 0.000000e+00 : f32
    %35 = vector.broadcast %cst_13 : f32 to vector<16x128xf32>
    %36 = arith.maximumf %34, %35 : vector<16x128xf32>
    %c0_14 = arith.constant 0 : index
    %c0_15 = arith.constant 0 : index
    %37 = vector.load %arg4[%c0_14, %c0_15] : memref<128x512xf32, #tpu.memory_space<vmem>>, vector<128x512xf32>
    %cst_16 = arith.constant dense<0.000000e+00> : vector<16x512xf32>
    %38 = tpu.matmul %36, %37, %cst_16 {dimension_numbers = #tpu.dot_dimension_numbers<[1], [0], [0], [1], [0, 0, 1, 1], [], []>} : vector<16x128xf32>, vector<128x512xf32>, vector<16x512xf32> -> vector<16x512xf32>
    %c0_17 = arith.constant 0 : index
    %c0_18 = arith.constant 0 : index
    %39 = vector.load %arg5[%c0_17, %c0_18] : memref<1x512xf32, #tpu.memory_space<vmem>>, vector<1x512xf32>
    %40 = vector.broadcast %39 : vector<1x512xf32> to vector<16x512xf32>
    %41 = arith.addf %38, %40 : vector<16x512xf32>
    %c0_i32_19 = arith.constant 0 : i32
    %42 = tpu.memref_slice %arg12[%c0_i32_19] : memref<2x!tpu.dma_semaphore, #tpu.memory_space<semaphore_mem>> -> memref<1x!tpu.dma_semaphore, #tpu.memory_space<semaphore_mem>>
    %43 = tpu.memref_squeeze %42 : memref<1x!tpu.dma_semaphore, #tpu.memory_space<semaphore_mem>> -> memref<!tpu.dma_semaphore, #tpu.memory_space<semaphore_mem>>
    tpu.wait_dma2 semaphore(%43 : memref<!tpu.dma_semaphore, #tpu.memory_space<semaphore_mem>>) src(%arg7 : memref<128x512xf32, #tpu.memory_space<any>>) dst(%arg10 : memref<128x512xf32, #tpu.memory_space<vmem>>)
    %cst_20 = arith.constant 0.000000e+00 : f32
    %44 = vector.broadcast %cst_20 : f32 to vector<2x128xf32>
    %cst_21 = arith.constant 0.000000e+00 : f32
    %45 = vector.broadcast %cst_21 : f32 to vector<2x128xf32>
    %46 = vector.extract_strided_slice %41 {offsets = [0, 0], sizes = [2, 512], strides = [1, 1]} : vector<16x512xf32> to vector<2x512xf32>
    %c0_22 = arith.constant 0 : index
    %c0_23 = arith.constant 0 : index
    %47 = vector.load %arg10[%c0_22, %c0_23] : memref<128x512xf32, #tpu.memory_space<vmem>>, vector<128x512xf32>
    %cst_24 = arith.constant dense<0.000000e+00> : vector<2x512xf32>
    %48 = tpu.matmul %44, %47, %cst_24 {dimension_numbers = #tpu.dot_dimension_numbers<[1], [0], [0], [1], [0, 0, 1, 1], [], []>} : vector<2x128xf32>, vector<128x512xf32>, vector<2x512xf32> -> vector<2x512xf32>
    %49 = arith.addf %46, %48 : vector<2x512xf32>
    %50 = vector.extract_strided_slice %49 {offsets = [0, 0], sizes = [2, 128], strides = [1, 1]} : vector<2x512xf32> to vector<2x128xf32>
    %51 = arith.negf %50 : vector<2x128xf32>
    %52 = math.exp %51 : vector<2x128xf32>
    %cst_25 = arith.constant 1.000000e+00 : f32
    %53 = vector.broadcast %cst_25 : f32 to vector<2x128xf32>
    %54 = arith.addf %53, %52 : vector<2x128xf32>
    %55 = arith.divf %53, %54 : vector<2x128xf32>
    %56 = vector.extract_strided_slice %49 {offsets = [0, 128], sizes = [2, 128], strides = [1, 1]} : vector<2x512xf32> to vector<2x128xf32>
    %57 = arith.negf %56 : vector<2x128xf32>
    %58 = math.exp %57 : vector<2x128xf32>
    %cst_26 = arith.constant 1.000000e+00 : f32
    %59 = vector.broadcast %cst_26 : f32 to vector<2x128xf32>
    %60 = arith.addf %59, %58 : vector<2x128xf32>
    %61 = arith.divf %59, %60 : vector<2x128xf32>
    %62 = vector.extract_strided_slice %49 {offsets = [0, 256], sizes = [2, 128], strides = [1, 1]} : vector<2x512xf32> to vector<2x128xf32>
    %63 = math.tanh %62 : vector<2x128xf32>
    %64 = vector.extract_strided_slice %49 {offsets = [0, 384], sizes = [2, 128], strides = [1, 1]} : vector<2x512xf32> to vector<2x128xf32>
    %65 = arith.negf %64 : vector<2x128xf32>
    %66 = math.exp %65 : vector<2x128xf32>
    %cst_27 = arith.constant 1.000000e+00 : f32
    %67 = vector.broadcast %cst_27 : f32 to vector<2x128xf32>
    %68 = arith.addf %67, %66 : vector<2x128xf32>
    %69 = arith.divf %67, %68 : vector<2x128xf32>
    %70 = arith.mulf %61, %45 : vector<2x128xf32>
    %71 = arith.mulf %55, %63 : vector<2x128xf32>
    %72 = arith.addf %70, %71 : vector<2x128xf32>
    %73 = math.tanh %72 : vector<2x128xf32>
    %74 = arith.mulf %69, %73 : vector<2x128xf32>
    %75 = vector.extract_strided_slice %41 {offsets = [2, 0], sizes = [2, 512], strides = [1, 1]} : vector<16x512xf32> to vector<2x512xf32>
    %c0_28 = arith.constant 0 : index
    %c0_29 = arith.constant 0 : index
    %76 = vector.load %arg10[%c0_28, %c0_29] : memref<128x512xf32, #tpu.memory_space<vmem>>, vector<128x512xf32>
    %cst_30 = arith.constant dense<0.000000e+00> : vector<2x512xf32>
    %77 = tpu.matmul %74, %76, %cst_30 {dimension_numbers = #tpu.dot_dimension_numbers<[1], [0], [0], [1], [0, 0, 1, 1], [], []>} : vector<2x128xf32>, vector<128x512xf32>, vector<2x512xf32> -> vector<2x512xf32>
    %78 = arith.addf %75, %77 : vector<2x512xf32>
    %79 = vector.extract_strided_slice %78 {offsets = [0, 0], sizes = [2, 128], strides = [1, 1]} : vector<2x512xf32> to vector<2x128xf32>
    %80 = arith.negf %79 : vector<2x128xf32>
    %81 = math.exp %80 : vector<2x128xf32>
    %cst_31 = arith.constant 1.000000e+00 : f32
    %82 = vector.broadcast %cst_31 : f32 to vector<2x128xf32>
    %83 = arith.addf %82, %81 : vector<2x128xf32>
    %84 = arith.divf %82, %83 : vector<2x128xf32>
    %85 = vector.extract_strided_slice %78 {offsets = [0, 128], sizes = [2, 128], strides = [1, 1]} : vector<2x512xf32> to vector<2x128xf32>
    %86 = arith.negf %85 : vector<2x128xf32>
    %87 = math.exp %86 : vector<2x128xf32>
    %cst_32 = arith.constant 1.000000e+00 : f32
    %88 = vector.broadcast %cst_32 : f32 to vector<2x128xf32>
    %89 = arith.addf %88, %87 : vector<2x128xf32>
    %90 = arith.divf %88, %89 : vector<2x128xf32>
    %91 = vector.extract_strided_slice %78 {offsets = [0, 256], sizes = [2, 128], strides = [1, 1]} : vector<2x512xf32> to vector<2x128xf32>
    %92 = math.tanh %91 : vector<2x128xf32>
    %93 = vector.extract_strided_slice %78 {offsets = [0, 384], sizes = [2, 128], strides = [1, 1]} : vector<2x512xf32> to vector<2x128xf32>
    %94 = arith.negf %93 : vector<2x128xf32>
    %95 = math.exp %94 : vector<2x128xf32>
    %cst_33 = arith.constant 1.000000e+00 : f32
    %96 = vector.broadcast %cst_33 : f32 to vector<2x128xf32>
    %97 = arith.addf %96, %95 : vector<2x128xf32>
    %98 = arith.divf %96, %97 : vector<2x128xf32>
    %99 = arith.mulf %90, %72 : vector<2x128xf32>
    %100 = arith.mulf %84, %92 : vector<2x128xf32>
    %101 = arith.addf %99, %100 : vector<2x128xf32>
    %102 = math.tanh %101 : vector<2x128xf32>
    %103 = arith.mulf %98, %102 : vector<2x128xf32>
    %104 = vector.extract_strided_slice %41 {offsets = [4, 0], sizes = [2, 512], strides = [1, 1]} : vector<16x512xf32> to vector<2x512xf32>
    %c0_34 = arith.constant 0 : index
    %c0_35 = arith.constant 0 : index
    %105 = vector.load %arg10[%c0_34, %c0_35] : memref<128x512xf32, #tpu.memory_space<vmem>>, vector<128x512xf32>
    %cst_36 = arith.constant dense<0.000000e+00> : vector<2x512xf32>
    %106 = tpu.matmul %103, %105, %cst_36 {dimension_numbers = #tpu.dot_dimension_numbers<[1], [0], [0], [1], [0, 0, 1, 1], [], []>} : vector<2x128xf32>, vector<128x512xf32>, vector<2x512xf32> -> vector<2x512xf32>
    %107 = arith.addf %104, %106 : vector<2x512xf32>
    %108 = vector.extract_strided_slice %107 {offsets = [0, 0], sizes = [2, 128], strides = [1, 1]} : vector<2x512xf32> to vector<2x128xf32>
    %109 = arith.negf %108 : vector<2x128xf32>
    %110 = math.exp %109 : vector<2x128xf32>
    %cst_37 = arith.constant 1.000000e+00 : f32
    %111 = vector.broadcast %cst_37 : f32 to vector<2x128xf32>
    %112 = arith.addf %111, %110 : vector<2x128xf32>
    %113 = arith.divf %111, %112 : vector<2x128xf32>
    %114 = vector.extract_strided_slice %107 {offsets = [0, 128], sizes = [2, 128], strides = [1, 1]} : vector<2x512xf32> to vector<2x128xf32>
    %115 = arith.negf %114 : vector<2x128xf32>
    %116 = math.exp %115 : vector<2x128xf32>
    %cst_38 = arith.constant 1.000000e+00 : f32
    %117 = vector.broadcast %cst_38 : f32 to vector<2x128xf32>
    %118 = arith.addf %117, %116 : vector<2x128xf32>
    %119 = arith.divf %117, %118 : vector<2x128xf32>
    %120 = vector.extract_strided_slice %107 {offsets = [0, 256], sizes = [2, 128], strides = [1, 1]} : vector<2x512xf32> to vector<2x128xf32>
    %121 = math.tanh %120 : vector<2x128xf32>
    %122 = vector.extract_strided_slice %107 {offsets = [0, 384], sizes = [2, 128], strides = [1, 1]} : vector<2x512xf32> to vector<2x128xf32>
    %123 = arith.negf %122 : vector<2x128xf32>
    %124 = math.exp %123 : vector<2x128xf32>
    %cst_39 = arith.constant 1.000000e+00 : f32
    %125 = vector.broadcast %cst_39 : f32 to vector<2x128xf32>
    %126 = arith.addf %125, %124 : vector<2x128xf32>
    %127 = arith.divf %125, %126 : vector<2x128xf32>
    %128 = arith.mulf %119, %101 : vector<2x128xf32>
    %129 = arith.mulf %113, %121 : vector<2x128xf32>
    %130 = arith.addf %128, %129 : vector<2x128xf32>
    %131 = math.tanh %130 : vector<2x128xf32>
    %132 = arith.mulf %127, %131 : vector<2x128xf32>
    %133 = vector.extract_strided_slice %41 {offsets = [6, 0], sizes = [2, 512], strides = [1, 1]} : vector<16x512xf32> to vector<2x512xf32>
    %c0_40 = arith.constant 0 : index
    %c0_41 = arith.constant 0 : index
    %134 = vector.load %arg10[%c0_40, %c0_41] : memref<128x512xf32, #tpu.memory_space<vmem>>, vector<128x512xf32>
    %cst_42 = arith.constant dense<0.000000e+00> : vector<2x512xf32>
    %135 = tpu.matmul %132, %134, %cst_42 {dimension_numbers = #tpu.dot_dimension_numbers<[1], [0], [0], [1], [0, 0, 1, 1], [], []>} : vector<2x128xf32>, vector<128x512xf32>, vector<2x512xf32> -> vector<2x512xf32>
    %136 = arith.addf %133, %135 : vector<2x512xf32>
    %137 = vector.extract_strided_slice %136 {offsets = [0, 0], sizes = [2, 128], strides = [1, 1]} : vector<2x512xf32> to vector<2x128xf32>
    %138 = arith.negf %137 : vector<2x128xf32>
    %139 = math.exp %138 : vector<2x128xf32>
    %cst_43 = arith.constant 1.000000e+00 : f32
    %140 = vector.broadcast %cst_43 : f32 to vector<2x128xf32>
    %141 = arith.addf %140, %139 : vector<2x128xf32>
    %142 = arith.divf %140, %141 : vector<2x128xf32>
    %143 = vector.extract_strided_slice %136 {offsets = [0, 128], sizes = [2, 128], strides = [1, 1]} : vector<2x512xf32> to vector<2x128xf32>
    %144 = arith.negf %143 : vector<2x128xf32>
    %145 = math.exp %144 : vector<2x128xf32>
    %cst_44 = arith.constant 1.000000e+00 : f32
    %146 = vector.broadcast %cst_44 : f32 to vector<2x128xf32>
    %147 = arith.addf %146, %145 : vector<2x128xf32>
    %148 = arith.divf %146, %147 : vector<2x128xf32>
    %149 = vector.extract_strided_slice %136 {offsets = [0, 256], sizes = [2, 128], strides = [1, 1]} : vector<2x512xf32> to vector<2x128xf32>
    %150 = math.tanh %149 : vector<2x128xf32>
    %151 = vector.extract_strided_slice %136 {offsets = [0, 384], sizes = [2, 128], strides = [1, 1]} : vector<2x512xf32> to vector<2x128xf32>
    %152 = arith.negf %151 : vector<2x128xf32>
    %153 = math.exp %152 : vector<2x128xf32>
    %cst_45 = arith.constant 1.000000e+00 : f32
    %154 = vector.broadcast %cst_45 : f32 to vector<2x128xf32>
    %155 = arith.addf %154, %153 : vector<2x128xf32>
    %156 = arith.divf %154, %155 : vector<2x128xf32>
    %157 = arith.mulf %148, %130 : vector<2x128xf32>
    %158 = arith.mulf %142, %150 : vector<2x128xf32>
    %159 = arith.addf %157, %158 : vector<2x128xf32>
    %160 = math.tanh %159 : vector<2x128xf32>
    %161 = arith.mulf %156, %160 : vector<2x128xf32>
    %162 = vector.extract_strided_slice %41 {offsets = [8, 0], sizes = [2, 512], strides = [1, 1]} : vector<16x512xf32> to vector<2x512xf32>
    %c0_46 = arith.constant 0 : index
    %c0_47 = arith.constant 0 : index
    %163 = vector.load %arg10[%c0_46, %c0_47] : memref<128x512xf32, #tpu.memory_space<vmem>>, vector<128x512xf32>
    %cst_48 = arith.constant dense<0.000000e+00> : vector<2x512xf32>
    %164 = tpu.matmul %161, %163, %cst_48 {dimension_numbers = #tpu.dot_dimension_numbers<[1], [0], [0], [1], [0, 0, 1, 1], [], []>} : vector<2x128xf32>, vector<128x512xf32>, vector<2x512xf32> -> vector<2x512xf32>
    %165 = arith.addf %162, %164 : vector<2x512xf32>
    %166 = vector.extract_strided_slice %165 {offsets = [0, 0], sizes = [2, 128], strides = [1, 1]} : vector<2x512xf32> to vector<2x128xf32>
    %167 = arith.negf %166 : vector<2x128xf32>
    %168 = math.exp %167 : vector<2x128xf32>
    %cst_49 = arith.constant 1.000000e+00 : f32
    %169 = vector.broadcast %cst_49 : f32 to vector<2x128xf32>
    %170 = arith.addf %169, %168 : vector<2x128xf32>
    %171 = arith.divf %169, %170 : vector<2x128xf32>
    %172 = vector.extract_strided_slice %165 {offsets = [0, 128], sizes = [2, 128], strides = [1, 1]} : vector<2x512xf32> to vector<2x128xf32>
    %173 = arith.negf %172 : vector<2x128xf32>
    %174 = math.exp %173 : vector<2x128xf32>
    %cst_50 = arith.constant 1.000000e+00 : f32
    %175 = vector.broadcast %cst_50 : f32 to vector<2x128xf32>
    %176 = arith.addf %175, %174 : vector<2x128xf32>
    %177 = arith.divf %175, %176 : vector<2x128xf32>
    %178 = vector.extract_strided_slice %165 {offsets = [0, 256], sizes = [2, 128], strides = [1, 1]} : vector<2x512xf32> to vector<2x128xf32>
    %179 = math.tanh %178 : vector<2x128xf32>
    %180 = vector.extract_strided_slice %165 {offsets = [0, 384], sizes = [2, 128], strides = [1, 1]} : vector<2x512xf32> to vector<2x128xf32>
    %181 = arith.negf %180 : vector<2x128xf32>
    %182 = math.exp %181 : vector<2x128xf32>
    %cst_51 = arith.constant 1.000000e+00 : f32
    %183 = vector.broadcast %cst_51 : f32 to vector<2x128xf32>
    %184 = arith.addf %183, %182 : vector<2x128xf32>
    %185 = arith.divf %183, %184 : vector<2x128xf32>
    %186 = arith.mulf %177, %159 : vector<2x128xf32>
    %187 = arith.mulf %171, %179 : vector<2x128xf32>
    %188 = arith.addf %186, %187 : vector<2x128xf32>
    %189 = math.tanh %188 : vector<2x128xf32>
    %190 = arith.mulf %185, %189 : vector<2x128xf32>
    %191 = vector.extract_strided_slice %41 {offsets = [10, 0], sizes = [2, 512], strides = [1, 1]} : vector<16x512xf32> to vector<2x512xf32>
    %c0_52 = arith.constant 0 : index
    %c0_53 = arith.constant 0 : index
    %192 = vector.load %arg10[%c0_52, %c0_53] : memref<128x512xf32, #tpu.memory_space<vmem>>, vector<128x512xf32>
    %cst_54 = arith.constant dense<0.000000e+00> : vector<2x512xf32>
    %193 = tpu.matmul %190, %192, %cst_54 {dimension_numbers = #tpu.dot_dimension_numbers<[1], [0], [0], [1], [0, 0, 1, 1], [], []>} : vector<2x128xf32>, vector<128x512xf32>, vector<2x512xf32> -> vector<2x512xf32>
    %194 = arith.addf %191, %193 : vector<2x512xf32>
    %195 = vector.extract_strided_slice %194 {offsets = [0, 0], sizes = [2, 128], strides = [1, 1]} : vector<2x512xf32> to vector<2x128xf32>
    %196 = arith.negf %195 : vector<2x128xf32>
    %197 = math.exp %196 : vector<2x128xf32>
    %cst_55 = arith.constant 1.000000e+00 : f32
    %198 = vector.broadcast %cst_55 : f32 to vector<2x128xf32>
    %199 = arith.addf %198, %197 : vector<2x128xf32>
    %200 = arith.divf %198, %199 : vector<2x128xf32>
    %201 = vector.extract_strided_slice %194 {offsets = [0, 128], sizes = [2, 128], strides = [1, 1]} : vector<2x512xf32> to vector<2x128xf32>
    %202 = arith.negf %201 : vector<2x128xf32>
    %203 = math.exp %202 : vector<2x128xf32>
    %cst_56 = arith.constant 1.000000e+00 : f32
    %204 = vector.broadcast %cst_56 : f32 to vector<2x128xf32>
    %205 = arith.addf %204, %203 : vector<2x128xf32>
    %206 = arith.divf %204, %205 : vector<2x128xf32>
    %207 = vector.extract_strided_slice %194 {offsets = [0, 256], sizes = [2, 128], strides = [1, 1]} : vector<2x512xf32> to vector<2x128xf32>
    %208 = math.tanh %207 : vector<2x128xf32>
    %209 = vector.extract_strided_slice %194 {offsets = [0, 384], sizes = [2, 128], strides = [1, 1]} : vector<2x512xf32> to vector<2x128xf32>
    %210 = arith.negf %209 : vector<2x128xf32>
    %211 = math.exp %210 : vector<2x128xf32>
    %cst_57 = arith.constant 1.000000e+00 : f32
    %212 = vector.broadcast %cst_57 : f32 to vector<2x128xf32>
    %213 = arith.addf %212, %211 : vector<2x128xf32>
    %214 = arith.divf %212, %213 : vector<2x128xf32>
    %215 = arith.mulf %206, %188 : vector<2x128xf32>
    %216 = arith.mulf %200, %208 : vector<2x128xf32>
    %217 = arith.addf %215, %216 : vector<2x128xf32>
    %218 = math.tanh %217 : vector<2x128xf32>
    %219 = arith.mulf %214, %218 : vector<2x128xf32>
    %220 = vector.extract_strided_slice %41 {offsets = [12, 0], sizes = [2, 512], strides = [1, 1]} : vector<16x512xf32> to vector<2x512xf32>
    %c0_58 = arith.constant 0 : index
    %c0_59 = arith.constant 0 : index
    %221 = vector.load %arg10[%c0_58, %c0_59] : memref<128x512xf32, #tpu.memory_space<vmem>>, vector<128x512xf32>
    %cst_60 = arith.constant dense<0.000000e+00> : vector<2x512xf32>
    %222 = tpu.matmul %219, %221, %cst_60 {dimension_numbers = #tpu.dot_dimension_numbers<[1], [0], [0], [1], [0, 0, 1, 1], [], []>} : vector<2x128xf32>, vector<128x512xf32>, vector<2x512xf32> -> vector<2x512xf32>
    %223 = arith.addf %220, %222 : vector<2x512xf32>
    %224 = vector.extract_strided_slice %223 {offsets = [0, 0], sizes = [2, 128], strides = [1, 1]} : vector<2x512xf32> to vector<2x128xf32>
    %225 = arith.negf %224 : vector<2x128xf32>
    %226 = math.exp %225 : vector<2x128xf32>
    %cst_61 = arith.constant 1.000000e+00 : f32
    %227 = vector.broadcast %cst_61 : f32 to vector<2x128xf32>
    %228 = arith.addf %227, %226 : vector<2x128xf32>
    %229 = arith.divf %227, %228 : vector<2x128xf32>
    %230 = vector.extract_strided_slice %223 {offsets = [0, 128], sizes = [2, 128], strides = [1, 1]} : vector<2x512xf32> to vector<2x128xf32>
    %231 = arith.negf %230 : vector<2x128xf32>
    %232 = math.exp %231 : vector<2x128xf32>
    %cst_62 = arith.constant 1.000000e+00 : f32
    %233 = vector.broadcast %cst_62 : f32 to vector<2x128xf32>
    %234 = arith.addf %233, %232 : vector<2x128xf32>
    %235 = arith.divf %233, %234 : vector<2x128xf32>
    %236 = vector.extract_strided_slice %223 {offsets = [0, 256], sizes = [2, 128], strides = [1, 1]} : vector<2x512xf32> to vector<2x128xf32>
    %237 = math.tanh %236 : vector<2x128xf32>
    %238 = vector.extract_strided_slice %223 {offsets = [0, 384], sizes = [2, 128], strides = [1, 1]} : vector<2x512xf32> to vector<2x128xf32>
    %239 = arith.negf %238 : vector<2x128xf32>
    %240 = math.exp %239 : vector<2x128xf32>
    %cst_63 = arith.constant 1.000000e+00 : f32
    %241 = vector.broadcast %cst_63 : f32 to vector<2x128xf32>
    %242 = arith.addf %241, %240 : vector<2x128xf32>
    %243 = arith.divf %241, %242 : vector<2x128xf32>
    %244 = arith.mulf %235, %217 : vector<2x128xf32>
    %245 = arith.mulf %229, %237 : vector<2x128xf32>
    %246 = arith.addf %244, %245 : vector<2x128xf32>
    %247 = math.tanh %246 : vector<2x128xf32>
    %248 = arith.mulf %243, %247 : vector<2x128xf32>
    %249 = vector.extract_strided_slice %41 {offsets = [14, 0], sizes = [2, 512], strides = [1, 1]} : vector<16x512xf32> to vector<2x512xf32>
    %c0_64 = arith.constant 0 : index
    %c0_65 = arith.constant 0 : index
    %250 = vector.load %arg10[%c0_64, %c0_65] : memref<128x512xf32, #tpu.memory_space<vmem>>, vector<128x512xf32>
    %cst_66 = arith.constant dense<0.000000e+00> : vector<2x512xf32>
    %251 = tpu.matmul %248, %250, %cst_66 {dimension_numbers = #tpu.dot_dimension_numbers<[1], [0], [0], [1], [0, 0, 1, 1], [], []>} : vector<2x128xf32>, vector<128x512xf32>, vector<2x512xf32> -> vector<2x512xf32>
    %252 = arith.addf %249, %251 : vector<2x512xf32>
    %253 = vector.extract_strided_slice %252 {offsets = [0, 0], sizes = [2, 128], strides = [1, 1]} : vector<2x512xf32> to vector<2x128xf32>
    %254 = arith.negf %253 : vector<2x128xf32>
    %255 = math.exp %254 : vector<2x128xf32>
    %cst_67 = arith.constant 1.000000e+00 : f32
    %256 = vector.broadcast %cst_67 : f32 to vector<2x128xf32>
    %257 = arith.addf %256, %255 : vector<2x128xf32>
    %258 = arith.divf %256, %257 : vector<2x128xf32>
    %259 = vector.extract_strided_slice %252 {offsets = [0, 128], sizes = [2, 128], strides = [1, 1]} : vector<2x512xf32> to vector<2x128xf32>
    %260 = arith.negf %259 : vector<2x128xf32>
    %261 = math.exp %260 : vector<2x128xf32>
    %cst_68 = arith.constant 1.000000e+00 : f32
    %262 = vector.broadcast %cst_68 : f32 to vector<2x128xf32>
    %263 = arith.addf %262, %261 : vector<2x128xf32>
    %264 = arith.divf %262, %263 : vector<2x128xf32>
    %265 = vector.extract_strided_slice %252 {offsets = [0, 256], sizes = [2, 128], strides = [1, 1]} : vector<2x512xf32> to vector<2x128xf32>
    %266 = math.tanh %265 : vector<2x128xf32>
    %267 = vector.extract_strided_slice %252 {offsets = [0, 384], sizes = [2, 128], strides = [1, 1]} : vector<2x512xf32> to vector<2x128xf32>
    %268 = arith.negf %267 : vector<2x128xf32>
    %269 = math.exp %268 : vector<2x128xf32>
    %cst_69 = arith.constant 1.000000e+00 : f32
    %270 = vector.broadcast %cst_69 : f32 to vector<2x128xf32>
    %271 = arith.addf %270, %269 : vector<2x128xf32>
    %272 = arith.divf %270, %271 : vector<2x128xf32>
    %273 = arith.mulf %264, %246 : vector<2x128xf32>
    %274 = arith.mulf %258, %266 : vector<2x128xf32>
    %275 = arith.addf %273, %274 : vector<2x128xf32>
    %276 = math.tanh %275 : vector<2x128xf32>
    %277 = arith.mulf %272, %276 : vector<2x128xf32>
    %278 = tpu.concatenate %74, %103, %132, %161, %190, %219, %248, %277 in 0 : vector<2x128xf32>, vector<2x128xf32>, vector<2x128xf32>, vector<2x128xf32>, vector<2x128xf32>, vector<2x128xf32>, vector<2x128xf32>, vector<2x128xf32> -> vector<16x128xf32>
    %c1_i32_70 = arith.constant 1 : i32
    %279 = tpu.memref_slice %arg12[%c1_i32_70] : memref<2x!tpu.dma_semaphore, #tpu.memory_space<semaphore_mem>> -> memref<1x!tpu.dma_semaphore, #tpu.memory_space<semaphore_mem>>
    %280 = tpu.memref_squeeze %279 : memref<1x!tpu.dma_semaphore, #tpu.memory_space<semaphore_mem>> -> memref<!tpu.dma_semaphore, #tpu.memory_space<semaphore_mem>>
    tpu.wait_dma2 semaphore(%280 : memref<!tpu.dma_semaphore, #tpu.memory_space<semaphore_mem>>) src(%arg8 : memref<128x128xf32, #tpu.memory_space<any>>) dst(%arg11 : memref<128x128xf32, #tpu.memory_space<vmem>>)
    %c0_71 = arith.constant 0 : index
    %c0_72 = arith.constant 0 : index
    %281 = vector.load %arg11[%c0_71, %c0_72] : memref<128x128xf32, #tpu.memory_space<vmem>>, vector<128x128xf32>
    %cst_73 = arith.constant dense<0.000000e+00> : vector<16x128xf32>
    %282 = tpu.matmul %278, %281, %cst_73 {dimension_numbers = #tpu.dot_dimension_numbers<[1], [0], [0], [1], [0, 0, 1, 1], [], []>} : vector<16x128xf32>, vector<128x128xf32>, vector<16x128xf32> -> vector<16x128xf32>
    %c0_74 = arith.constant 0 : index
    %c0_75 = arith.constant 0 : index
    %283 = vector.load %arg6[%c0_74, %c0_75] : memref<1x128xf32, #tpu.memory_space<vmem>>, vector<1x128xf32>
    %284 = vector.broadcast %283 : vector<1x128xf32> to vector<16x128xf32>
    %285 = arith.addf %282, %284 : vector<16x128xf32>
    %c0_76 = arith.constant 0 : index
    %c0_77 = arith.constant 0 : index
    %286 = vector.load %arg9[%c0_76, %c0_77] : memref<16x128xf32, #tpu.memory_space<vmem>>, vector<16x128xf32>
    tpu.vector_store %arg9[%c0_76, %c0_77], %285 {strides = array<i32>} : memref<16x128xf32, #tpu.memory_space<vmem>>, vector<16x128xf32>,
    return
  }
}

</mosaic_0001>

<bundles_post_ra>
// kernel: tile.18
= control target key start
LH: loop header
LB: loop body
LE: loop exit
PB: predicated region body
PF: predicated region fallthrough
CT: control target
= control target key end

     0   :  { %s22_s0 = inlined_call_operand.vmem [shape: f32[16], index: 0, kind: input, shape index: {}]   ;;  %s23_s1 = inlined_call_operand.vmem [shape: f32[8,16], index: 1, kind: output, shape index: {}]  }
   0x1   :  { %v4_v0 = vld [vmem:[%s22_s0] ss:$0 sm:$0xff] }
   0x2   :  { %5 = vst [vmem:[%s23_s1] sm:$0xff] %v4_v0 }

// kernel: gnn_route_planning_forward.1
= control target key start
LH: loop header
LB: loop body
LE: loop exit
PB: predicated region body
PF: predicated region fallthrough
CT: control target
= control target key end

     0   :  { %s4624_s0 = inlined_call_operand.vmem [shape: f32[16,32], index: 0, kind: input, shape index: {}]   ;;  %s4625_s1 = inlined_call_operand.vmem [shape: f32[32,128], index: 1, kind: input, shape index: {}]   ;;  %s4626_s2 = inlined_call_operand.vmem [shape: f32[3,128], index: 2, kind: input, shape index: {}]   ;;  %s4627_s3 = inlined_call_operand.vmem [shape: f32[128,128], index: 3, kind: input, shape index: {}]   ;;  %s4628_s4 = inlined_call_operand.vmem [shape: f32[128,512], index: 4, kind: input, shape index: {}]   ;;  %s4629_s5 = inlined_call_operand.vmem [shape: f32[1,512], index: 5, kind: input, shape index: {}]   ;;  %s4630_s6 = inlined_call_operand.vmem [shape: f32[1,128], index: 6, kind: input, shape index: {}]   ;;  %s4631_s7 = inlined_call_operand.vmem [shape: f32[128,512], index: 7, kind: input, shape index: {}]   ;;  %s4632_s8 = inlined_call_operand.vmem [shape: f32[128,128], index: 8, kind: input, shape index: {}]   ;;  %s4633_s9 = inlined_call_operand.vmem [shape: f32[16,128], index: 9, kind: output, shape index: {}]  }
   0x1   :  { %v3409_v0 = vld [vmem:[%s4631_s7] sm:$0xff]  ;;  %v3414_v1 = vld [vmem:[%s4631_s7 + $0x8] sm:$0xff]  ;;  %v3419_v2 = vld [vmem:[%s4631_s7 + $0x10] sm:$0xff] }
   0x2   :  { %v3424_v3 = vld [vmem:[%s4631_s7 + $0x18] sm:$0xff]  ;;  %v3429_v4 = vld [vmem:[%s4631_s7 + $0x20] sm:$0xff]  ;;  %v3434_v5 = vld [vmem:[%s4631_s7 + $0x28] sm:$0xff] }
   0x3   :  { %v3439_v6 = vld [vmem:[%s4631_s7 + $0x30] sm:$0xff]  ;;  %v3444_v7 = vld [vmem:[%s4631_s7 + $0x38] sm:$0xff]  ;;  %v3449_v8 = vld [vmem:[%s4631_s7 + $0x40] sm:$0xff] }
   0x4   :  { %v3454_v9 = vld [vmem:[%s4631_s7 + $0x48] sm:$0xff]  ;;  %v3459_v10 = vld [vmem:[%s4631_s7 + $0x50] sm:$0xff]  ;;  %v3464_v11 = vld [vmem:[%s4631_s7 + $0x58] sm:$0xff] }
   0x5   :  { %v3469_v12 = vld [vmem:[%s4631_s7 + $0x60] sm:$0xff]  ;;  %v3474_v13 = vld [vmem:[%s4631_s7 + $0x68] sm:$0xff]  ;;  %v3479_v14 = vld [vmem:[%s4631_s7 + $0x70] sm:$0xff] }
   0x6   :  { %v3484_v15 = vld [vmem:[%s4631_s7 + $0x78] sm:$0xff]  ;;  %v3489_v16 = vld [vmem:[%s4631_s7 + $0x80] sm:$0xff]  ;;  %v3494_v17 = vld [vmem:[%s4631_s7 + $0x88] sm:$0xff] }
   0x7   :  { %v3499_v18 = vld [vmem:[%s4631_s7 + $0x90] sm:$0xff]  ;;  %v3504_v19 = vld [vmem:[%s4631_s7 + $0x98] sm:$0xff]  ;;  %v3509_v20 = vld [vmem:[%s4631_s7 + $0xa0] sm:$0xff] }
   0x8   :  { %v3514_v21 = vld [vmem:[%s4631_s7 + $0xa8] sm:$0xff]  ;;  %v3519_v22 = vld [vmem:[%s4631_s7 + $0xb0] sm:$0xff]  ;;  %v3524_v23 = vld [vmem:[%s4631_s7 + $0xb8] sm:$0xff] }
   0x9   :  { %v3529_v24 = vld [vmem:[%s4631_s7 + $0xc0] sm:$0xff]  ;;  %v3534_v25 = vld [vmem:[%s4631_s7 + $0xc8] sm:$0xff]  ;;  %v3539_v26 = vld [vmem:[%s4631_s7 + $0xd0] sm:$0xff] }
   0xa   :  { %v3544_v27 = vld [vmem:[%s4631_s7 + $0xd8] sm:$0xff]  ;;  %v3549_v28 = vld [vmem:[%s4631_s7 + $0xe0] sm:$0xff]  ;;  %v3554_v29 = vld [vmem:[%s4631_s7 + $0xe8] sm:$0xff] }
   0xb   :  { %v3559_v30 = vld [vmem:[%s4631_s7 + $0xf0] sm:$0xff]  ;;  %v3564_v31 = vld [vmem:[%s4631_s7 + $0xf8] sm:$0xff]  ;;  %v3569_v32 = vld [vmem:[%s4631_s7 + $0x100] sm:$0xff] }
   0xc   :  { %v3574_v33 = vld [vmem:[%s4631_s7 + $0x108] sm:$0xff]  ;;  %v3579_v34 = vld [vmem:[%s4631_s7 + $0x110] sm:$0xff]  ;;  %v3584_v35 = vld [vmem:[%s4631_s7 + $0x118] sm:$0xff] }
   0xd   :  { %v3589_v36 = vld [vmem:[%s4631_s7 + $0x120] sm:$0xff]  ;;  %v3594_v37 = vld [vmem:[%s4631_s7 + $0x128] sm:$0xff]  ;;  %v3599_v38 = vld [vmem:[%s4631_s7 + $0x130] sm:$0xff] }
   0xe   :  { %v3604_v39 = vld [vmem:[%s4631_s7 + $0x138] sm:$0xff]  ;;  %v3609_v40 = vld [vmem:[%s4631_s7 + $0x140] sm:$0xff]  ;;  %v3614_v41 = vld [vmem:[%s4631_s7 + $0x148] sm:$0xff] }
   0xf   :  { %4636 = vst [vmem:[#allocation9_spill] sm:$0xff] %v3609_v40  ;;  %v3619_v42 = vld [vmem:[%s4631_s7 + $0x150] sm:$0xff]  ;;  %v3624_v43 = vld [vmem:[%s4631_s7 + $0x158] sm:$0xff]  ;;  %v3629_v44 = vld [vmem:[%s4631_s7 + $0x160] sm:$0xff] }
  0x10   :  { %4637 = vst [vmem:[#allocation10_spill] sm:$0xff] %v3619_v42  ;;  %4638 = vst [vmem:[#allocation11_spill] sm:$0xff] %v3624_v43  ;;  %v3634_v45 = vld [vmem:[%s4631_s7 + $0x168] sm:$0xff]  ;;  %v3639_v46 = vld [vmem:[%s4631_s7 + $0x170] sm:$0xff] }
  0x11   :  { %4639 = vst [vmem:[#allocation12_spill] sm:$0xff] %v3629_v44  ;;  %4640 = vst [vmem:[#allocation13_spill] sm:$0xff] %v3639_v46  ;;  %v3644_v47 = vld [vmem:[%s4631_s7 + $0x178] sm:$0xff]  ;;  %v3649_v48 = vld [vmem:[%s4631_s7 + $0x180] sm:$0xff] }
  0x12   :  { %4641 = vst [vmem:[#allocation14_spill] sm:$0xff] %v3644_v47  ;;  %4642 = vst [vmem:[#allocation15_spill] sm:$0xff] %v3649_v48  ;;  %v3654_v49 = vld [vmem:[%s4631_s7 + $0x188] sm:$0xff]  ;;  %v3659_v50 = vld [vmem:[%s4631_s7 + $0x190] sm:$0xff] }
  0x13   :  { %4643 = vst [vmem:[#allocation16_spill] sm:$0xff] %v3654_v49  ;;  %4644 = vst [vmem:[#allocation17_spill] sm:$0xff] %v3659_v50  ;;  %v3664_v51 = vld [vmem:[%s4631_s7 + $0x198] sm:$0xff]  ;;  %v3669_v52 = vld [vmem:[%s4631_s7 + $0x1a0] sm:$0xff] }
  0x14   :  { %4645 = vst [vmem:[#allocation18_spill] sm:$0xff] %v3664_v51  ;;  %4646 = vst [vmem:[#allocation19_spill] sm:$0xff] %v3669_v52  ;;  %v3674_v53 = vld [vmem:[%s4631_s7 + $0x1a8] sm:$0xff]  ;;  %v3679_v54 = vld [vmem:[%s4631_s7 + $0x1b0] sm:$0xff] }
  0x15   :  { %4647 = vst [vmem:[#allocation20_spill] sm:$0xff] %v3674_v53  ;;  %4648 = vst [vmem:[#allocation21_spill] sm:$0xff] %v3679_v54  ;;  %v3684_v55 = vld [vmem:[%s4631_s7 + $0x1b8] sm:$0xff]  ;;  %v3689_v56 = vld [vmem:[%s4631_s7 + $0x1c0] sm:$0xff] }
  0x16   :  { %4649 = vst [vmem:[#allocation22_spill] sm:$0xff] %v3684_v55  ;;  %4650 = vst [vmem:[#allocation23_spill] sm:$0xff] %v3689_v56  ;;  %v3694_v57 = vld [vmem:[%s4631_s7 + $0x1c8] sm:$0xff]  ;;  %v3699_v58 = vld [vmem:[%s4631_s7 + $0x1d0] sm:$0xff] }
  0x17   :  { %4651 = vst [vmem:[#allocation24_spill] sm:$0xff] %v3694_v57  ;;  %4652 = vst [vmem:[#allocation25_spill] sm:$0xff] %v3699_v58  ;;  %v3704_v59 = vld [vmem:[%s4631_s7 + $0x1d8] sm:$0xff]  ;;  %v3709_v60 = vld [vmem:[%s4631_s7 + $0x1e0] sm:$0xff] }
  0x18   :  { %4653 = vst [vmem:[#allocation26_spill] sm:$0xff] %v3704_v59  ;;  %4654 = vst [vmem:[#allocation27_spill] sm:$0xff] %v3709_v60  ;;  %v3714_v61 = vld [vmem:[%s4631_s7 + $0x1e8] sm:$0xff]  ;;  %v3719_v62 = vld [vmem:[%s4631_s7 + $0x1f0] sm:$0xff] }
  0x19   :  { %4655 = vst [vmem:[#allocation28_spill] sm:$0xff] %v3714_v61  ;;  %4656 = vst [vmem:[#allocation29_spill] sm:$0xff] %v3719_v62  ;;  %v3724_v63 = vld [vmem:[%s4631_s7 + $0x1f8] sm:$0xff] }
  0x1a   :  { %4657 = vst [vmem:[#allocation30_spill] sm:$0xff] %v3724_v63 }
  0x1b   :  { %195 = vsyncadd [#allocation4], 8192  ;;  %v3729_v58 = vld [vmem:[%s4632_s8] sm:$0xff]  ;;  %v3734_v60 = vld [vmem:[%s4632_s8 + $0x8] sm:$0xff] }
  0x1c   :  { %4658 = vst [vmem:[#allocation31_spill] sm:$0xff] %v3729_v58  ;;  %4659 = vst [vmem:[#allocation32_spill] sm:$0xff] %v3734_v60  ;;  %v3739_v62 = vld [vmem:[%s4632_s8 + $0x10] sm:$0xff]  ;;  %v3744_v56 = vld [vmem:[%s4632_s8 + $0x18] sm:$0xff] }
  0x1d   :  { %4660 = vst [vmem:[#allocation33_spill] sm:$0xff] %v3739_v62  ;;  %4661 = vst [vmem:[#allocation34_spill] sm:$0xff] %v3744_v56  ;;  %v3749_v63 = vld [vmem:[%s4632_s8 + $0x20] sm:$0xff]  ;;  %v3754_v58 = vld [vmem:[%s4632_s8 + $0x28] sm:$0xff] }
  0x1e   :  { %4662 = vst [vmem:[#allocation35_spill] sm:$0xff] %v3749_v63  ;;  %4663 = vst [vmem:[#allocation36_spill] sm:$0xff] %v3754_v58  ;;  %v3759_v60 = vld [vmem:[%s4632_s8 + $0x30] sm:$0xff]  ;;  %v3764_v62 = vld [vmem:[%s4632_s8 + $0x38] sm:$0xff] }
  0x1f   :  { %4664 = vst [vmem:[#allocation37_spill] sm:$0xff] %v3759_v60  ;;  %4665 = vst [vmem:[#allocation38_spill] sm:$0xff] %v3764_v62  ;;  %v3769_v56 = vld [vmem:[%s4632_s8 + $0x40] sm:$0xff]  ;;  %v3774_v63 = vld [vmem:[%s4632_s8 + $0x48] sm:$0xff] }
  0x20   :  { %4666 = vst [vmem:[#allocation39_spill] sm:$0xff] %v3769_v56  ;;  %4667 = vst [vmem:[#allocation40_spill] sm:$0xff] %v3774_v63  ;;  %v3779_v58 = vld [vmem:[%s4632_s8 + $0x50] sm:$0xff]  ;;  %v3784_v60 = vld [vmem:[%s4632_s8 + $0x58] sm:$0xff] }
  0x21   :  { %4668 = vst [vmem:[#allocation41_spill] sm:$0xff] %v3779_v58  ;;  %4669 = vst [vmem:[#allocation42_spill] sm:$0xff] %v3784_v60  ;;  %v3789_v62 = vld [vmem:[%s4632_s8 + $0x60] sm:$0xff]  ;;  %v3794_v56 = vld [vmem:[%s4632_s8 + $0x68] sm:$0xff] }
  0x22   :  { %4670 = vst [vmem:[#allocation43_spill] sm:$0xff] %v3789_v62  ;;  %4671 = vst [vmem:[#allocation44_spill] sm:$0xff] %v3794_v56  ;;  %v3799_v63 = vld [vmem:[%s4632_s8 + $0x70] sm:$0xff]  ;;  %v3804_v58 = vld [vmem:[%s4632_s8 + $0x78] sm:$0xff] }
  0x23   :  { %4672 = vst [vmem:[#allocation45_spill] sm:$0xff] %v3799_v63  ;;  %4673 = vst [vmem:[#allocation46_spill] sm:$0xff] %v3804_v58 }
  0x24   :  { %268 = vsyncadd [#allocation4 + $0x1], 2048  ;;  %v271_v62 = vld [vmem:[%s4625_s1] sm:$0xff]  ;;  %v272_v60 = vld [vmem:[%s4625_s1 + $0x8] sm:$0xff]  ;;  %vm280_vm0 = vcmask 261120   ;;  %v3353_v54 = vmov 0.0|0.0  }
  0x25   :  { %v2576_v56 = vpack.c.bf16 %v272_v60, %v271_v62  ;;  %v273_v63 = vld [vmem:[%s4625_s1 + $0x10] sm:$0xff]  ;;  %v274_v59 = vld [vmem:[%s4625_s1 + $0x18] sm:$0xff]  ;;  %v269_v58 = vld [vmem:[%s4624_s0] sm:$0xff]  ;;  %2584 = vmatprep.subr.bf16.mxu1 %v3353_v54  ;;  %vm3354_vm1 = vmmov 0   ;;  %vm378_vm2 = vcmask 1040384  }
  0x26   :  { %v2580_v50 = vpack.c.bf16 %v274_v59, %v273_v63  ;;  %2503 = vmatprep.mubr.msk.f32.mxu0 %vm280_vm0, %v269_v58  ;;  %v380_v60 = vld [vmem:[%s4627_s3] sm:$0xff]  ;;  %v381_v62 = vld [vmem:[%s4627_s3 + $0x8] sm:$0xff]  ;;  %v382_v57 = vld [vmem:[%s4627_s3 + $0x10] sm:$0xff] }
  0x27   :  { %2577 = vmatprep.subr.bf16.mxu0 %v2576_v56  ;;  %v2585_v61 = vpack.c.bf16 %v381_v62, %v380_v60  ;;  %v383_v59 = vld [vmem:[%s4627_s3 + $0x18] sm:$0xff]  ;;  %v384_v63 = vld [vmem:[%s4627_s3 + $0x20] sm:$0xff]  ;;  %v385_v60 = vld [vmem:[%s4627_s3 + $0x28] sm:$0xff] }
  0x28   :  { %2579 = vmatpush3.bf16.msra.mxu0 %v2576_v56  ;;  %v2588_v58 = vpack.c.bf16 %v383_v59, %v382_v57  ;;  %v270_v62 = vld [vmem:[%s4624_s0 + $0x8] sm:$0xff]  ;;  %v2591_v52 = vpack.c.bf16 %v385_v60, %v384_v63  ;;  %v386_v56 = vld [vmem:[%s4627_s3 + $0x30] sm:$0xff]  ;;  %v387_v57 = vld [vmem:[%s4627_s3 + $0x38] sm:$0xff] }
  0x29   :  { %2581 = vmatprep.subr.bf16.mxu0 %v2580_v50  ;;  %2586 = vmatpush3.bf16.msra.mxu1 %v2585_v61  ;;  %v388_v61 = vld [vmem:[%s4627_s3 + $0x40] sm:$0xff]  ;;  %v391_v63 = vld [vmem:[%s4627_s3 + $0x58] sm:$0xff]  ;;  %v507_v53 = vld [vmem:[%s4628_s4 + $0x30] sm:$0xff] }
  0x2a   :  { %2587 = vmatprep.subr.bf16.mxu1 %v3353_v54 }
  0x2c   :  { %2583 = vmatpush3.bf16.msra.mxu0 %v2580_v50  ;;  %v2594_v50 = vpack.c.bf16 %v387_v57, %v386_v56  ;;  %v393_v56 = vld [vmem:[%s4627_s3 + $0x68] sm:$0xff] }
  0x2d   :  { %2589 = vmatpush3.bf16.msra.mxu1 %v2588_v58  ;;  %v390_v58 = vld [vmem:[%s4627_s3 + $0x50] sm:$0xff] }
  0x2e   :  { %2590 = vmatprep.subr.bf16.mxu1 %v3353_v54  ;;  %v2600_v60 = vpack.c.bf16 %v391_v63, %v390_v58  ;;  %v502_v58 = vld [vmem:[%s4628_s4 + $0x8] sm:$0xff] }
  0x2f   :  { %2504 = vmatmul.mubr.msk.f32.vlgmr.msra.gmra.mrb[0].mxu0 %vm280_vm0, %v270_v62  ;;  %v392_v62 = vld [vmem:[%s4627_s3 + $0x60] sm:$0xff]  ;;  %v506_v63 = vld [vmem:[%s4628_s4 + $0x28] sm:$0xff] }
  0x30   :  { %v2603_v57 = vpack.c.bf16 %v393_v56, %v392_v62  ;;  %v2608_v62 = vpack.c.bf16 %v506_v63, %v502_v58  ;;  %v508_v56 = vld [vmem:[%s4628_s4 + $0x38] sm:$0xff] }
  0x31   :  { %2592 = vmatpush3.bf16.msra.mxu1 %v2591_v52  ;;  %v389_v52 = vld [vmem:[%s4627_s3 + $0x48] sm:$0xff] }
  0x32   :  { %2593 = vmatprep.subr.bf16.mxu1 %v3353_v54  ;;  %v2597_v59 = vpack.c.bf16 %v389_v52, %v388_v61  ;;  %v395_v61 = vld [vmem:[%s4627_s3 + $0x78] sm:$0xff]  ;;  %v4634_v52 = vmov 0.0   ;;  %2609 = vmatprep.subr.bf16.mxu0 %v2608_v62 }
  0x33   :  { %2538 = vmatprep.mubr.msk.f32.mxu1 %vm3354_vm1, %v4634_v52  ;;  %651 = vmatprep.mubr.f32.mxu0 %v4634_v52 }
  0x35   :  { %2595 = vmatpush3.bf16.msra.mxu1 %v2594_v50  ;;  %v394_v50 = vld [vmem:[%s4627_s3 + $0x70] sm:$0xff] }
  0x36   :  { %2596 = vmatprep.subr.bf16.mxu1 %v3353_v54 }
  0x39   :  { %2598 = vmatpush3.bf16.msra.mxu1 %v2597_v59  ;;  %v2606_v59 = vpack.c.bf16 %v395_v61, %v394_v50 }
  0x3a   :  { %2599 = vmatprep.subr.bf16.mxu1 %v3353_v54 }
  0x3d   :  { %2601 = vmatpush3.bf16.msra.mxu1 %v2600_v60  ;;  %v504_v60 = vld [vmem:[%s4628_s4 + $0x18] sm:$0xff] }
  0x3e   :  { %2602 = vmatprep.subr.bf16.mxu1 %v3353_v54  ;;  %v2640_v50 = vpack.c.bf16 %v508_v56, %v504_v60 }
  0x41   :  { %2604 = vmatpush3.bf16.msra.mxu1 %v2603_v57  ;;  %v505_v57 = vld [vmem:[%s4628_s4 + $0x20] sm:$0xff] }
  0x42   :  { %2605 = vmatprep.subr.bf16.mxu1 %v3353_v54  ;;  %v501_v54 = vld [vmem:[%s4628_s4] sm:$0xff] }
  0x43   :  { %v2610_v61 = vpack.c.bf16 %v505_v57, %v501_v54 }
  0x45   :  { %2607 = vmatpush3.bf16.msra.mxu1 %v2606_v59  ;;  %2611 = vmatpush1.bf16.msra.mxu0 %v2610_v61  ;;  %v2422_v59 = vld [vmem:[%s4626_s2] ss:$0 sm:$0xff] }
  0x46   :  { %2641 = vmatprep.subr.bf16.mxu1 %v2640_v50 }
 0x102   :  { %v2505_v58 = vpop.f32.mrb[0].mxu0 }
 0x103   :  { %v3897_v63 = vadd.f32 %v2505_v58, %v2422_v59  ;;  %v353_v52 = vpop.f32.mrb[1].mxu0 }
 0x104   :  { %v3899_v48 = vadd.f32 %v2422_v59, %v353_v52  ;;  %v503_v59 = vld [vmem:[%s4628_s4 + $0x10] sm:$0xff] }
 0x105   :  { %v370_v55 = vmul.f32 %v3897_v63, %v3897_v63 }
 0x106   :  { %v362_v60 = vadd.f32 %v3897_v63, %v3899_v48  ;;  %v369_v62 = vmul.f32 %v3899_v48, %v3899_v48 }
 0x108   :  { %v363_v56 = vrot.slane %v362_v60, 4  ;;  %v371_v54 = vadd.f32 %v370_v55, %v369_v62 }
 0x10a   :  { %v364_v57 = vadd.f32 %v363_v56, %v362_v60  ;;  %v372_v50 = vrot.slane %v371_v54, 4  ;;  %v2642_v60 = vpack.c.bf16 %v507_v53, %v503_v59  ;;  %v4674_v56 = vmov 0.0   ;;  %v513_v53 = vld [vmem:[%s4628_s4 + $0x60] sm:$0xff]  ;;  %v518_v59 = vld [vmem:[%s4628_s4 + $0x88] sm:$0xff] }
 0x10c   :  { %v365_v61 = vrot.slane %v364_v57, 2  ;;  %v373_v51 = vadd.f32 %v372_v50, %v371_v54  ;;  %v512_v54 = vld [vmem:[%s4628_s4 + $0x58] sm:$0xff] }
 0x10e   :  { %v366_v58 = vadd.f32 %v365_v61, %v364_v57  ;;  %v374_v46 = vrot.slane %v373_v51, 2  ;;  %v511_v61 = vld [vmem:[%s4628_s4 + $0x50] sm:$0xff] }
 0x110   :  { %v367_v42 = vrot.slane %v366_v58, 1  ;;  %v375_v52 = vadd.f32 %v374_v46, %v373_v51  ;;  %v510_v46 = vld [vmem:[%s4628_s4 + $0x48] sm:$0xff] }
 0x111   :  { %v514_v51 = vld [vmem:[%s4628_s4 + $0x68] sm:$0xff] }
 0x112   :  { %v376_v49 = vrot.slane %v375_v52, 1  ;;  %v368_v44 = vadd.f32 %v367_v42, %v366_v58  ;;  %v2612_v42 = vpack.c.bf16 %v514_v51, %v510_v46  ;;  %v515_v58 = vld [vmem:[%s4628_s4 + $0x70] sm:$0xff]  ;;  %v524_v46 = vld [vmem:[%s4628_s4 + $0xb8] sm:$0xff]  ;;  %v517_v51 = vld [vmem:[%s4628_s4 + $0x80] sm:$0xff] }
 0x114   :  { %v377_v55 = vadd.f32 %v376_v49, %v375_v52  ;;  %v509_v49 = vld [vmem:[%s4628_s4 + $0x40] sm:$0xff]  ;;  %2613 = vmatprep.subr.bf16.mxu0 %v2612_v42  ;;  %v2646_v52 = vpack.c.bf16 %v515_v58, %v511_v61  ;;  %v530_v61 = vld [vmem:[%s4628_s4 + $0xe8] sm:$0xff]  ;;  %v528_v58 = vld [vmem:[%s4628_s4 + $0xd8] sm:$0xff] }
 0x115   :  { %v2614_v50 = vpack.c.bf16 %v513_v53, %v509_v49  ;;  %v519_v49 = vld [vmem:[%s4628_s4 + $0x90] sm:$0xff] }
 0x116   :  { %v379_v62 = vsel %vm378_vm2, %v368_v44, %v377_v55  ;;  %v516_v44 = vld [vmem:[%s4628_s4 + $0x78] sm:$0xff]  ;;  %v522_v55 = vld [vmem:[%s4628_s4 + $0xa8] sm:$0xff]  ;;  %v523_v53 = vld [vmem:[%s4628_s4 + $0xb0] sm:$0xff] }
 0x117   :  { %2539 = vmatmul.mubr.f32.vlgmr.msra.gmra.mrb[0].mxu1 %v379_v62  ;;  %v2644_v57 = vpack.c.bf16 %v516_v44, %v512_v54  ;;  %2615 = vmatpush1.bf16.msra.mxu0 %v2614_v50  ;;  %v2616_v62 = vpack.c.bf16 %v522_v55, %v518_v59  ;;  %v521_v54 = vld [vmem:[%s4628_s4 + $0xa0] sm:$0xff]  ;;  %v526_v50 = vld [vmem:[%s4628_s4 + $0xc8] sm:$0xff]  ;;  %v532_v59 = vld [vmem:[%s4628_s4 + $0xf8] sm:$0xff] }
 0x118   :  { %2643 = vmatpush1.bf16.msra.mxu1 %v2642_v60  ;;  %728 = vmatprep.mubr.f32.mxu1 %v4674_v56  ;;  %v520_v60 = vld [vmem:[%s4628_s4 + $0x98] sm:$0xff]  ;;  %v2618_v44 = vpack.c.bf16 %v521_v54, %v517_v51  ;;  %v525_v55 = vld [vmem:[%s4628_s4 + $0xc0] sm:$0xff]  ;;  %v527_v51 = vld [vmem:[%s4628_s4 + $0xd0] sm:$0xff] }
 0x119   :  { %2645 = vmatprep.subr.bf16.mxu1 %v2644_v57  ;;  %v2648_v42 = vpack.c.bf16 %v524_v46, %v520_v60  ;;  %2617 = vmatprep.subr.bf16.mxu0 %v2616_v62  ;;  %v2650_v57 = vpack.c.bf16 %v523_v53, %v519_v49  ;;  %v529_v60 = vld [vmem:[%s4628_s4 + $0xe0] sm:$0xff]  ;;  %v2652_v62 = vpack.c.bf16 %v532_v59, %v528_v58  ;;  %v531_v54 = vld [vmem:[%s4628_s4 + $0xf0] sm:$0xff]  ;;  %v538_v49 = vld [vmem:[%s4628_s4 + $0x128] sm:$0xff] }
 0x11a   :  { %v2622_v46 = vpack.c.bf16 %v529_v60, %v525_v55  ;;  %v536_v53 = vld [vmem:[%s4628_s4 + $0x118] sm:$0xff]  ;;  %v537_v58 = vld [vmem:[%s4628_s4 + $0x120] sm:$0xff]  ;;  %v535_v55 = vld [vmem:[%s4628_s4 + $0x110] sm:$0xff] }
 0x11b   :  { %2619 = vmatpush1.bf16.msra.mxu0 %v2618_v44  ;;  %v534_v44 = vld [vmem:[%s4628_s4 + $0x108] sm:$0xff]  ;;  %v539_v60 = vld [vmem:[%s4628_s4 + $0x130] sm:$0xff] }
 0x11c   :  { %2647 = vmatpush1.bf16.msra.mxu1 %v2646_v52  ;;  %v2620_v52 = vpack.c.bf16 %v530_v61, %v526_v50  ;;  %v540_v50 = vld [vmem:[%s4628_s4 + $0x138] sm:$0xff]  ;;  %v533_v61 = vld [vmem:[%s4628_s4 + $0x100] sm:$0xff] }
 0x11d   :  { %2649 = vmatprep.subr.bf16.mxu1 %v2648_v42  ;;  %v2654_v42 = vpack.c.bf16 %v531_v54, %v527_v51  ;;  %v2626_v59 = vpack.c.bf16 %v537_v58, %v533_v61  ;;  %v546_v51 = vld [vmem:[%s4628_s4 + $0x168] sm:$0xff]  ;;  %v544_v54 = vld [vmem:[%s4628_s4 + $0x158] sm:$0xff]  ;;  %v543_v61 = vld [vmem:[%s4628_s4 + $0x150] sm:$0xff] }
 0x11e   :  { %2621 = vmatprep.subr.bf16.mxu0 %v2620_v52  ;;  %v2656_v52 = vpack.c.bf16 %v540_v50, %v536_v53  ;;  %v545_v53 = vld [vmem:[%s4628_s4 + $0x160] sm:$0xff]  ;;  %v547_v58 = vld [vmem:[%s4628_s4 + $0x170] sm:$0xff] }
 0x11f   :  { %2623 = vmatpush1.bf16.msra.mxu0 %v2622_v46  ;;  %v542_v46 = vld [vmem:[%s4628_s4 + $0x148] sm:$0xff] }
 0x120   :  { %2651 = vmatpush1.bf16.msra.mxu1 %v2650_v57  ;;  %v2624_v57 = vpack.c.bf16 %v538_v49, %v534_v44  ;;  %v548_v44 = vld [vmem:[%s4628_s4 + $0x178] sm:$0xff]  ;;  %v541_v49 = vld [vmem:[%s4628_s4 + $0x140] sm:$0xff] }
 0x121   :  { %2653 = vmatprep.subr.bf16.mxu1 %v2652_v62  ;;  %v2658_v62 = vpack.c.bf16 %v539_v60, %v535_v55  ;;  %v2630_v50 = vpack.c.bf16 %v545_v53, %v541_v49  ;;  %v554_v55 = vld [vmem:[%s4628_s4 + $0x1a8] sm:$0xff]  ;;  %v552_v60 = vld [vmem:[%s4628_s4 + $0x198] sm:$0xff]  ;;  %v551_v49 = vld [vmem:[%s4628_s4 + $0x190] sm:$0xff] }
 0x122   :  { %2625 = vmatprep.subr.bf16.mxu0 %v2624_v57  ;;  %v2660_v57 = vpack.c.bf16 %v548_v44, %v544_v54  ;;  %v553_v54 = vld [vmem:[%s4628_s4 + $0x1a0] sm:$0xff]  ;;  %v555_v53 = vld [vmem:[%s4628_s4 + $0x1b0] sm:$0xff] }
 0x123   :  { %2627 = vmatpush1.bf16.msra.mxu0 %v2626_v59  ;;  %v550_v59 = vld [vmem:[%s4628_s4 + $0x188] sm:$0xff] }
 0x124   :  { %2655 = vmatpush1.bf16.msra.mxu1 %v2654_v42  ;;  %v2628_v42 = vpack.c.bf16 %v546_v51, %v542_v46  ;;  %v556_v46 = vld [vmem:[%s4628_s4 + $0x1b8] sm:$0xff]  ;;  %v549_v51 = vld [vmem:[%s4628_s4 + $0x180] sm:$0xff] }
 0x125   :  { %2657 = vmatprep.subr.bf16.mxu1 %v2656_v52  ;;  %v2662_v52 = vpack.c.bf16 %v547_v58, %v543_v61  ;;  %v2634_v44 = vpack.c.bf16 %v553_v54, %v549_v51  ;;  %v562_v61 = vld [vmem:[%s4628_s4 + $0x1e8] sm:$0xff]  ;;  %v560_v58 = vld [vmem:[%s4628_s4 + $0x1d8] sm:$0xff]  ;;  %v559_v51 = vld [vmem:[%s4628_s4 + $0x1d0] sm:$0xff] }
 0x126   :  { %2629 = vmatprep.subr.bf16.mxu0 %v2628_v42  ;;  %v2664_v42 = vpack.c.bf16 %v556_v46, %v552_v60  ;;  %v561_v60 = vld [vmem:[%s4628_s4 + $0x1e0] sm:$0xff]  ;;  %v563_v54 = vld [vmem:[%s4628_s4 + $0x1f0] sm:$0xff] }
 0x127   :  { %2631 = vmatpush1.bf16.msra.mxu0 %v2630_v50  ;;  %v558_v50 = vld [vmem:[%s4628_s4 + $0x1c8] sm:$0xff] }
 0x128   :  { %2659 = vmatpush1.bf16.msra.mxu1 %v2658_v62  ;;  %v2632_v62 = vpack.c.bf16 %v554_v55, %v550_v59  ;;  %v564_v59 = vld [vmem:[%s4628_s4 + $0x1f8] sm:$0xff]  ;;  %v557_v55 = vld [vmem:[%s4628_s4 + $0x1c0] sm:$0xff] }
 0x129   :  { %2661 = vmatprep.subr.bf16.mxu1 %v2660_v57  ;;  %v2666_v57 = vpack.c.bf16 %v555_v53, %v551_v49  ;;  %v2638_v46 = vpack.c.bf16 %v561_v60, %v557_v55 }
 0x12a   :  { %2633 = vmatprep.subr.bf16.mxu0 %v2632_v62  ;;  %v2668_v62 = vpack.c.bf16 %v564_v59, %v560_v58 }
 0x12b   :  { %2635 = vmatpush1.bf16.msra.mxu0 %v2634_v44 }
 0x12c   :  { %2663 = vmatpush1.bf16.msra.mxu1 %v2662_v52  ;;  %v2636_v52 = vpack.c.bf16 %v562_v61, %v558_v50  ;;  %v471_v50 = vlaneseq }
 0x12d   :  { %2665 = vmatprep.subr.bf16.mxu1 %v2664_v42  ;;  %v2670_v42 = vpack.c.bf16 %v563_v54, %v559_v51 }
 0x12e   :  { %2637 = vmatprep.subr.bf16.mxu0 %v2636_v52  ;;  %v472_v59 = vshrl.u32 %v471_v50, 7 }
 0x12f   :  { %2639 = vmatpush1.bf16.msra.mxu0 %v2638_v46  ;;  %v2425_v46 = vld [vmem:[%s4626_s2 + $0x1] ss:$0 sm:$0xff] }
 0x130   :  { %2667 = vmatpush1.bf16.msra.mxu1 %v2666_v57  ;;  %v473_v55 = vsub.s32 0, %v472_v59  ;;  %v481_v40 = vsub.s32 1, %v472_v59 }
 0x131   :  { %2669 = vmatprep.subr.bf16.mxu1 %v2668_v62 }
 0x134   :  { %2671 = vmatpush1.bf16.msra.mxu1 %v2670_v42  ;;  %v2426_v42 = vld [vmem:[%s4626_s2 + $0x2] ss:$0 sm:$0xff] }
 0x1ea   :  { %v462_v44 = vpop.f32.mrb[0].mxu1 }
 0x1eb   :  { %v466_v49 = vmul.f32 %v462_v44, %v462_v44  ;;  %v2540_v53 = vpop.f32.mrb[1].mxu1  ;;  %v474_v60 = vrot.slane %v462_v44, %v473_v55 }
 0x1ed   :  { %v468_v57 = vrot.slane %v466_v49, 7  ;;  %v475_v43 = vsub.f32 %v3899_v48, %v474_v60  ;;  %v476_v52 = vsub.f32 %v3897_v63, %v474_v60  ;;  %v565_v48 = vld [vmem:[%s4629_s5] sm:$0xf]  ;;  %v581_v63 = vsub.s32 3, %v472_v59 }
 0x1ee   :  { %v574_v60 = vrot.slane %v565_v48, %v481_v40 }
 0x1ef   :  { %v470_v61 = vsub.f32 %v462_v44, %v468_v57 }
 0x1f1   :  { %v477_v58 = vadd.f32 1e-05, %v470_v61  ;;  %v570_v61 = vrot.slane %v565_v48, %v473_v55 }
 0x1f3   :  { %3219 = vrsqrt.f32 %v477_v58 }
 0x1fd   :  { %v3220_v47 = vpop.eup %3219 }
 0x1fe   :  { %v482_v62 = vrot.slane %v3220_v47, %v481_v40 }
 0x200   :  { %v483_v51 = vmul.f32 %v482_v62, %v475_v43  ;;  %v484_v54 = vmul.f32 %v482_v62, %v476_v52  ;;  %v577_v43 = vsub.s32 2, %v472_v59  ;;  %v582_v52 = vrot.slane %v565_v48, %v581_v63 }
 0x201   :  { %v4113_v63 = vpack.c.bf16 %v3434_v5, %v3414_v1 }
 0x202   :  { %v490_v49 = vmul.f32 %v2425_v46, %v483_v51  ;;  %v491_v53 = vmul.f32 %v2425_v46, %v484_v54  ;;  %v578_v58 = vrot.slane %v565_v48, %v577_v43 }
 0x204   :  { %v497_v44 = vadd.f32 %v2426_v42, %v490_v49  ;;  %v498_v50 = vadd.f32 %v2426_v42, %v491_v53 }
 0x206   :  { %v499_v57 = vmax.f32 %v497_v44, 0.0  ;;  %v500_v47 = vmax.f32 %v498_v50, 0.0 }
 0x208   :  { %652 = vmatmul.mubr.f32.vlgmr.msra.gmra.mrb[2].mxu0 %v499_v57  ;;  %729 = vmatmul.mubr.f32.vlgmr.msra.gmra.mrb[2].mxu1 %v499_v57 }
 0x209   :  { %657 = vmatprep.mubr.f32.mxu0 %v4674_v56  ;;  %734 = vmatprep.mubr.f32.mxu1 %v4674_v56 }
 0x20c   :  { %658 = vmatmul.mubr.f32.gmra.mrb[4].mxu0 %v500_v47  ;;  %735 = vmatmul.mubr.f32.gmra.mrb[4].mxu1 %v500_v47 }
 0x20d   :  { %873 = vmatprep.mubr.f32.mxu0 %v4674_v56 }
 0x2db   :  { %v653_v62 = vpop.f32.mrb[2].mxu0  ;;  %v730_v46 = vpop.f32.mrb[2].mxu1 }
 0x2dc   :  { %v4095_v51 = vadd.f32 %v653_v62, %v570_v61  ;;  %v4097_v54 = vadd.f32 %v730_v46, %v578_v58  ;;  %v655_v42 = vpop.f32.mrb[3].mxu0  ;;  %v732_v49 = vpop.f32.mrb[3].mxu1  ;;  %v4117_v62 = vpack.c.bf16 %v3429_v4, %v3409_v0 }
 0x2dd   :  { %v4099_v53 = vadd.f32 %v655_v42, %v574_v60  ;;  %v4101_v44 = vadd.f32 %v732_v49, %v582_v52 }
 0x2df   :  { %v659_v57 = vpop.f32.mrb[4].mxu0  ;;  %v736_v50 = vpop.f32.mrb[4].mxu1 }
 0x2e0   :  { %v4103_v47 = vadd.f32 %v659_v57, %v570_v61  ;;  %v4105_v59 = vadd.f32 %v736_v50, %v578_v58  ;;  %v661_v40 = vpop.f32.mrb[5].mxu0  ;;  %v738_v55 = vpop.f32.mrb[5].mxu1  ;;  %v4121_v61 = vpack.c.bf16 %v3474_v13, %v3454_v9 }
 0x2e1   :  { %v4107_v43 = vadd.f32 %v661_v40, %v574_v60  ;;  %v4109_v48 = vadd.f32 %v738_v55, %v582_v52 }
 0x2e2   :  { %3349 = dma.done.wait [#allocation4], 8192 }
 0x2e3   :  { %3350 = vsyncadd [#allocation4], 4294959104  ;;  %944 = vmatprep.mubr.f32.mxu1 %v4674_v56  ;;  %2673 = vmatprep.subr.bf16.mxu0 %v4113_v63  ;;  %v4128_v1 = vpack.c.bf16 %v3444_v7, %v3424_v3  ;;  %v4132_v0 = vpack.c.bf16 %v3439_v6, %v3419_v2  ;;  %v4137_v4 = vpack.c.bf16 %v3469_v12, %v3449_v8  ;;  %v4691_v58 = vld [vmem:[#allocation26_spill] sm:$0xff]  ;;  %v4693_v46 = vld [vmem:[#allocation23_spill] sm:$0xff]  ;;  %vm2277_vm3 = vcmask 1041408  }
 0x2e4   :  { %2675 = vmatpush1.bf16.msra.mxu0 %v4117_v62  ;;  %v4141_v5 = vpack.c.bf16 %v3484_v15, %v3464_v11  ;;  %v4146_v3 = vpack.c.bf16 %v3514_v21, %v3494_v17  ;;  %v4152_v2 = vpack.c.bf16 %v3479_v14, %v3459_v10  ;;  %v4157_v6 = vpack.c.bf16 %v3524_v23, %v3504_v19  ;;  %v4676_v19 = vld [vmem:[#allocation14_spill] sm:$0xff]  ;;  %v4677_v21 = vld [vmem:[#allocation9_spill] sm:$0xff]  ;;  %v4694_v42 = vld [vmem:[#allocation27_spill] sm:$0xff] }
 0x2e5   :  { %2677 = vmatprep.subr.bf16.mxu0 %v4121_v61  ;;  %2705 = vmatprep.subr.bf16.mxu1 %v4128_v1  ;;  %v4162_v7 = vpack.c.bf16 %v3509_v20, %v3489_v16  ;;  %v4167_v8 = vpack.c.bf16 %v3554_v29, %v3534_v25  ;;  %v4172_v9 = vpack.c.bf16 %v3519_v22, %v3499_v18  ;;  %v4675_v18 = vld [vmem:[#allocation11_spill] sm:$0xff]  ;;  %v4678_v22 = vld [vmem:[#allocation12_spill] sm:$0xff]  ;;  %v4692_v60 = vld [vmem:[#allocation30_spill] sm:$0xff]  ;;  %vm2279_vm4 = vcmask 1043456  }
 0x2e6   :  { %2707 = vmatpush1.bf16.msra.mxu1 %v4132_v0  ;;  %v4177_v10 = vpack.c.bf16 %v3564_v31, %v3544_v27  ;;  %v4182_v11 = vpack.c.bf16 %v3549_v28, %v3529_v24  ;;  %v4187_v12 = vpack.c.bf16 %v3594_v37, %v3574_v33  ;;  %v4192_v13 = vpack.c.bf16 %v3559_v30, %v3539_v26  ;;  %v4679_v24 = vld [vmem:[#allocation16_spill] sm:$0xff]  ;;  %v4681_v27 = vld [vmem:[#allocation10_spill] sm:$0xff]  ;;  %v4682_v28 = vld [vmem:[#allocation13_spill] sm:$0xff] }
 0x2e7   :  { %2709 = vmatprep.subr.bf16.mxu1 %v4141_v5  ;;  %v4197_v14 = vpack.c.bf16 %v3604_v39, %v3584_v35  ;;  %v4202_v15 = vpack.c.bf16 %v3589_v36, %v3569_v32  ;;  %v4207_v16 = vpack.c.bf16 %v3634_v45, %v3614_v41  ;;  %v4212_v17 = vpack.c.bf16 %v3599_v38, %v3579_v34  ;;  %v4680_v25 = vld [vmem:[#allocation20_spill] sm:$0xff]  ;;  %v4683_v30 = vld [vmem:[#allocation18_spill] sm:$0xff]  ;;  %v4685_v33 = vld [vmem:[#allocation15_spill] sm:$0xff] }
 0x2e8   :  { %2679 = vmatpush1.bf16.msra.mxu0 %v4137_v4  ;;  %v4217_v20 = vpack.c.bf16 %v4676_v19, %v4675_v18  ;;  %v4222_v23 = vpack.c.bf16 %v4678_v22, %v4677_v21  ;;  %v4227_v26 = vpack.c.bf16 %v4680_v25, %v4679_v24  ;;  %v4232_v29 = vpack.c.bf16 %v4682_v28, %v4681_v27  ;;  %v4684_v31 = vld [vmem:[#allocation22_spill] sm:$0xff]  ;;  %v4686_v34 = vld [vmem:[#allocation19_spill] sm:$0xff]  ;;  %v4687_v36 = vld [vmem:[#allocation24_spill] sm:$0xff] }
 0x2e9   :  { %2681 = vmatprep.subr.bf16.mxu0 %v4146_v3  ;;  %v4237_v32 = vpack.c.bf16 %v4684_v31, %v4683_v30  ;;  %v4242_v35 = vpack.c.bf16 %v4686_v34, %v4685_v33  ;;  %v4688_v37 = vld [vmem:[#allocation28_spill] sm:$0xff]  ;;  %v4689_v39 = vld [vmem:[#allocation17_spill] sm:$0xff]  ;;  %v4257_v52 = vpack.c.bf16 %v4692_v60, %v4691_v58  ;;  %v4262_v49 = vpack.c.bf16 %v4694_v42, %v4693_v46 }
 0x2ea   :  { %2711 = vmatpush1.bf16.msra.mxu1 %v4152_v2  ;;  %v4247_v38 = vpack.c.bf16 %v4688_v37, %v4687_v36  ;;  %v4690_v41 = vld [vmem:[#allocation21_spill] sm:$0xff]  ;;  %vm2281_vm5 = vcmask 1045504  }
 0x2eb   :  { %2713 = vmatprep.subr.bf16.mxu1 %v4157_v6  ;;  %v4252_v45 = vpack.c.bf16 %v4690_v41, %v4689_v39  ;;  %v4695_v57 = vld [vmem:[#allocation25_spill] sm:$0xff] }
 0x2ec   :  { %2683 = vmatpush1.bf16.msra.mxu0 %v4162_v7  ;;  %v4696_v50 = vld [vmem:[#allocation29_spill] sm:$0xff] }
 0x2ed   :  { %2685 = vmatprep.subr.bf16.mxu0 %v4167_v8  ;;  %v4268_v40 = vpack.c.bf16 %v4696_v50, %v4695_v57 }
 0x2ee   :  { %2715 = vmatpush1.bf16.msra.mxu1 %v4172_v9 }
 0x2ef   :  { %2717 = vmatprep.subr.bf16.mxu1 %v4177_v10 }
 0x2f0   :  { %2687 = vmatpush1.bf16.msra.mxu0 %v4182_v11 }
 0x2f1   :  { %2689 = vmatprep.subr.bf16.mxu0 %v4187_v12 }
 0x2f2   :  { %2719 = vmatpush1.bf16.msra.mxu1 %v4192_v13 }
 0x2f3   :  { %2721 = vmatprep.subr.bf16.mxu1 %v4197_v14 }
 0x2f4   :  { %2691 = vmatpush1.bf16.msra.mxu0 %v4202_v15 }
 0x2f5   :  { %2693 = vmatprep.subr.bf16.mxu0 %v4207_v16 }
 0x2f6   :  { %2723 = vmatpush1.bf16.msra.mxu1 %v4212_v17 }
 0x2f7   :  { %2725 = vmatprep.subr.bf16.mxu1 %v4217_v20 }
 0x2f8   :  { %2695 = vmatpush1.bf16.msra.mxu0 %v4222_v23 }
 0x2f9   :  { %2697 = vmatprep.subr.bf16.mxu0 %v4227_v26 }
 0x2fa   :  { %2727 = vmatpush1.bf16.msra.mxu1 %v4232_v29 }
 0x2fb   :  { %2729 = vmatprep.subr.bf16.mxu1 %v4237_v32 }
 0x2fc   :  { %2699 = vmatpush1.bf16.msra.mxu0 %v4242_v35 }
 0x2fd   :  { %2701 = vmatprep.subr.bf16.mxu0 %v4247_v38 }
 0x2fe   :  { %2731 = vmatpush1.bf16.msra.mxu1 %v4252_v45 }
 0x2ff   :  { %2733 = vmatprep.subr.bf16.mxu1 %v4257_v52 }
 0x300   :  { %2703 = vmatpush1.bf16.msra.mxu0 %v4262_v49 }
 0x301   :  { %2737 = vmatprep.subr.bf16.mxu0 %v4113_v63 }
 0x302   :  { %2735 = vmatpush1.bf16.msra.mxu1 %v4268_v40 }
 0x303   :  { %874 = vmatmul.mubr.f32.vlgmr.msra.gmra.mrb[6].mxu0 %v4674_v56  ;;  %2769 = vmatprep.subr.bf16.mxu1 %v4128_v1 }
 0x304   :  { %2739 = vmatpush1.bf16.msra.mxu0 %v4117_v62  ;;  %1043 = vmatprep.mubr.f32.mxu0 %v4674_v56 }
 0x305   :  { %945 = vmatmul.mubr.f32.vlgmr.msra.gmra.mrb[6].mxu1 %v4674_v56  ;;  %2741 = vmatprep.subr.bf16.mxu0 %v4121_v61 }
 0x306   :  { %2771 = vmatpush1.bf16.msra.mxu1 %v4132_v0  ;;  %1114 = vmatprep.mubr.f32.mxu1 %v4674_v56 }
 0x307   :  { %2773 = vmatprep.subr.bf16.mxu1 %v4141_v5 }
 0x308   :  { %2743 = vmatpush1.bf16.msra.mxu0 %v4137_v4 }
 0x309   :  { %2745 = vmatprep.subr.bf16.mxu0 %v4146_v3 }
 0x30a   :  { %2775 = vmatpush1.bf16.msra.mxu1 %v4152_v2 }
 0x30b   :  { %2777 = vmatprep.subr.bf16.mxu1 %v4157_v6 }
 0x30c   :  { %2747 = vmatpush1.bf16.msra.mxu0 %v4162_v7 }
 0x30d   :  { %2749 = vmatprep.subr.bf16.mxu0 %v4167_v8 }
 0x30e   :  { %2779 = vmatpush1.bf16.msra.mxu1 %v4172_v9 }
 0x30f   :  { %2781 = vmatprep.subr.bf16.mxu1 %v4177_v10 }
 0x310   :  { %2751 = vmatpush1.bf16.msra.mxu0 %v4182_v11 }
 0x311   :  { %2753 = vmatprep.subr.bf16.mxu0 %v4187_v12 }
 0x312   :  { %2783 = vmatpush1.bf16.msra.mxu1 %v4192_v13 }
 0x313   :  { %2785 = vmatprep.subr.bf16.mxu1 %v4197_v14 }
 0x314   :  { %2755 = vmatpush1.bf16.msra.mxu0 %v4202_v15 }
 0x315   :  { %2757 = vmatprep.subr.bf16.mxu0 %v4207_v16 }
 0x316   :  { %2787 = vmatpush1.bf16.msra.mxu1 %v4212_v17 }
 0x317   :  { %2789 = vmatprep.subr.bf16.mxu1 %v4217_v20 }
 0x318   :  { %2759 = vmatpush1.bf16.msra.mxu0 %v4222_v23 }
 0x319   :  { %2761 = vmatprep.subr.bf16.mxu0 %v4227_v26 }
 0x31a   :  { %2791 = vmatpush1.bf16.msra.mxu1 %v4232_v29 }
 0x31b   :  { %2793 = vmatprep.subr.bf16.mxu1 %v4237_v32 }
 0x31c   :  { %2763 = vmatpush1.bf16.msra.mxu0 %v4242_v35 }
 0x31d   :  { %2765 = vmatprep.subr.bf16.mxu0 %v4247_v38 }
 0x31e   :  { %2795 = vmatpush1.bf16.msra.mxu1 %v4252_v45 }
 0x31f   :  { %2797 = vmatprep.subr.bf16.mxu1 %v4257_v52 }
 0x320   :  { %2767 = vmatpush1.bf16.msra.mxu0 %v4262_v49 }
 0x321   :  { %2801 = vmatprep.subr.bf16.mxu0 %v4113_v63 }
 0x322   :  { %2799 = vmatpush1.bf16.msra.mxu1 %v4268_v40 }
 0x323   :  { %2833 = vmatprep.subr.bf16.mxu1 %v4128_v1 }
 0x3d6   :  { %v875_v55 = vpop.f32.mrb[6].mxu0 }
 0x3d7   :  { %v951_v18 = vadd.f32 %v875_v55, %v4095_v51  ;;  %v877_v19 = vpop.f32.mrb[7].mxu0 }
 0x3d8   :  { %v952_v21 = vadd.f32 %v877_v19, %v4099_v53  ;;  %v946_v22 = vpop.f32.mrb[6].mxu1 }
 0x3d9   :  { %v2427_v24 = vmul.f32 -1.442695, %v951_v18  ;;  %v948_v25 = vpop.f32.mrb[7].mxu1  ;;  %v953_v31 = vadd.f32 %v946_v22, %v4097_v54 }
 0x3da   :  { %v2428_v27 = vmul.f32 -1.442695, %v952_v21  ;;  %v954_v28 = vadd.f32 %v948_v25, %v4101_v44 }
 0x3db   :  { %3221 = vpow2.f32 %v2427_v24 }
 0x3dc   :  { %3223 = vpow2.f32 %v2428_v27  ;;  %v2429_v30 = vmul.f32 -1.442695, %v954_v28 }
 0x3de   :  { %3225 = vpow2.f32 %v2429_v30 }
 0x3df   :  { %3227 = vtanh.f32 %v953_v31 }
 0x3e5   :  { %v3222_v33 = vpop.eup %3221 }
 0x3e6   :  { %v3224_v34 = vpop.eup %3223  ;;  %v958_v36 = vadd.f32 1.0, %v3222_v33 }
 0x3e7   :  { %v964_v37 = vadd.f32 1.0, %v3224_v34 }
 0x3e8   :  { %3229 = vrcp.f32 %v958_v36  ;;  %v3226_v39 = vpop.eup %3225 }
 0x3e9   :  { %3231 = vrcp.f32 %v964_v37  ;;  %v3228_v41 = vpop.eup %3227  ;;  %v971_v60 = vadd.f32 1.0, %v3226_v39 }
 0x3eb   :  { %3233 = vrcp.f32 %v971_v60 }
 0x3f2   :  { %v3230_v58 = vpop.eup %3229 }
 0x3f3   :  { %v3232_v46 = vpop.eup %3231  ;;  %v975_v42 = vmul.f32 %v3230_v58, %v3228_v41 }
 0x3f4   :  { %v974_v57 = vmul.f32 0.0, %v3232_v46 }
 0x3f5   :  { %v3234_v55 = vpop.eup %3233 }
 0x3f6   :  { %v4315_v50 = vadd.f32 %v975_v42, %v974_v57 }
 0x3f8   :  { %3235 = vtanh.f32 %v4315_v50 }
 0x402   :  { %v3236_v18 = vpop.eup %3235 }
 0x403   :  { %v4318_v19 = vmul.f32 %v3236_v18, %v3234_v55 }
 0x405   :  { %1044 = vmatmul.mubr.f32.vlgmr.msra.gmra.mrb[8].mxu0 %v4318_v19  ;;  %1115 = vmatmul.mubr.f32.vlgmr.msra.gmra.mrb[8].mxu1 %v4318_v19 }
 0x406   :  { %2803 = vmatpush1.bf16.msra.mxu0 %v4117_v62  ;;  %2835 = vmatpush1.bf16.msra.mxu1 %v4132_v0 }
 0x407   :  { %2805 = vmatprep.subr.bf16.mxu0 %v4121_v61  ;;  %2837 = vmatprep.subr.bf16.mxu1 %v4141_v5 }
 0x408   :  { %1231 = vmatprep.mubr.f32.mxu0 %v4674_v56  ;;  %1302 = vmatprep.mubr.f32.mxu1 %v4674_v56 }
 0x40a   :  { %2807 = vmatpush1.bf16.msra.mxu0 %v4137_v4  ;;  %2839 = vmatpush1.bf16.msra.mxu1 %v4152_v2 }
 0x40b   :  { %2809 = vmatprep.subr.bf16.mxu0 %v4146_v3  ;;  %2841 = vmatprep.subr.bf16.mxu1 %v4157_v6 }
 0x40e   :  { %2811 = vmatpush1.bf16.msra.mxu0 %v4162_v7  ;;  %2843 = vmatpush1.bf16.msra.mxu1 %v4172_v9 }
 0x40f   :  { %2813 = vmatprep.subr.bf16.mxu0 %v4167_v8  ;;  %2845 = vmatprep.subr.bf16.mxu1 %v4177_v10 }
 0x412   :  { %2815 = vmatpush1.bf16.msra.mxu0 %v4182_v11  ;;  %2847 = vmatpush1.bf16.msra.mxu1 %v4192_v13 }
 0x413   :  { %2817 = vmatprep.subr.bf16.mxu0 %v4187_v12  ;;  %2849 = vmatprep.subr.bf16.mxu1 %v4197_v14 }
 0x416   :  { %2819 = vmatpush1.bf16.msra.mxu0 %v4202_v15  ;;  %2851 = vmatpush1.bf16.msra.mxu1 %v4212_v17 }
 0x417   :  { %2821 = vmatprep.subr.bf16.mxu0 %v4207_v16  ;;  %2853 = vmatprep.subr.bf16.mxu1 %v4217_v20 }
 0x41a   :  { %2823 = vmatpush1.bf16.msra.mxu0 %v4222_v23  ;;  %2855 = vmatpush1.bf16.msra.mxu1 %v4232_v29 }
 0x41b   :  { %2825 = vmatprep.subr.bf16.mxu0 %v4227_v26  ;;  %2857 = vmatprep.subr.bf16.mxu1 %v4237_v32 }
 0x41e   :  { %2827 = vmatpush1.bf16.msra.mxu0 %v4242_v35  ;;  %2859 = vmatpush1.bf16.msra.mxu1 %v4252_v45 }
 0x41f   :  { %2829 = vmatprep.subr.bf16.mxu0 %v4247_v38  ;;  %2861 = vmatprep.subr.bf16.mxu1 %v4257_v52 }
 0x422   :  { %2831 = vmatpush1.bf16.msra.mxu0 %v4262_v49  ;;  %2863 = vmatpush1.bf16.msra.mxu1 %v4268_v40 }
 0x423   :  { %2865 = vmatprep.subr.bf16.mxu0 %v4113_v63  ;;  %2897 = vmatprep.subr.bf16.mxu1 %v4128_v1 }
 0x4d8   :  { %v1045_v21 = vpop.f32.mrb[8].mxu0  ;;  %v1116_v22 = vpop.f32.mrb[8].mxu1 }
 0x4d9   :  { %v1125_v24 = vrot.slane %v1045_v21, 6  ;;  %v1047_v25 = vpop.f32.mrb[9].mxu0  ;;  %v1118_v27 = vpop.f32.mrb[9].mxu1  ;;  %v1127_v39 = vrot.slane %v1116_v22, 6 }
 0x4da   :  { %v1126_v28 = vrot.slane %v1047_v25, 6  ;;  %v1128_v36 = vrot.slane %v1118_v27, 6 }
 0x4db   :  { %v1133_v30 = vadd.f32 %v1125_v24, %v4095_v51  ;;  %v1135_v58 = vadd.f32 %v1127_v39, %v4097_v54  ;;  %v1157_v24 = vrot.slane %v4315_v50, 6 }
 0x4dc   :  { %v1134_v31 = vadd.f32 %v1126_v28, %v4099_v53  ;;  %v1136_v37 = vadd.f32 %v1128_v36, %v4101_v44 }
 0x4dd   :  { %v2430_v33 = vmul.f32 -1.442695, %v1133_v30 }
 0x4de   :  { %v2431_v34 = vmul.f32 -1.442695, %v1134_v31  ;;  %v2432_v41 = vmul.f32 -1.442695, %v1136_v37 }
 0x4df   :  { %3237 = vpow2.f32 %v2430_v33 }
 0x4e0   :  { %3239 = vpow2.f32 %v2431_v34 }
 0x4e1   :  { %3241 = vpow2.f32 %v2432_v41 }
 0x4e2   :  { %3243 = vtanh.f32 %v1135_v58 }
 0x4e9   :  { %v3238_v60 = vpop.eup %3237 }
 0x4ea   :  { %v3240_v46 = vpop.eup %3239  ;;  %v1140_v42 = vadd.f32 1.0, %v3238_v60 }
 0x4eb   :  { %v1146_v57 = vadd.f32 1.0, %v3240_v46  ;;  %v3242_v55 = vpop.eup %3241 }
 0x4ec   :  { %3245 = vrcp.f32 %v1140_v42  ;;  %v3244_v18 = vpop.eup %3243  ;;  %v1153_v28 = vadd.f32 1.0, %v3242_v55 }
 0x4ed   :  { %3247 = vrcp.f32 %v1146_v57 }
 0x4ee   :  { %3249 = vrcp.f32 %v1153_v28 }
 0x4f6   :  { %v3246_v21 = vpop.eup %3245 }
 0x4f7   :  { %v3248_v25 = vpop.eup %3247  ;;  %v1160_v27 = vmul.f32 %v3246_v21, %v3244_v18 }
 0x4f8   :  { %v1159_v22 = vmul.f32 %v3248_v25, %v1157_v24  ;;  %v3250_v31 = vpop.eup %3249 }
 0x4fa   :  { %v4361_v30 = vadd.f32 %v1160_v27, %v1159_v22 }
 0x4fc   :  { %3251 = vtanh.f32 %v4361_v30 }
 0x506   :  { %v3252_v33 = vpop.eup %3251 }
 0x507   :  { %v4364_v34 = vmul.f32 %v3252_v33, %v3250_v31 }
 0x509   :  { %v1165_v36 = vrot.slane %v4364_v34, 2 }
 0x50b   :  { %1232 = vmatmul.mubr.f32.vlgmr.msra.gmra.mrb[10].mxu0 %v1165_v36  ;;  %1303 = vmatmul.mubr.f32.vlgmr.msra.gmra.mrb[10].mxu1 %v1165_v36 }
 0x50c   :  { %2867 = vmatpush1.bf16.msra.mxu0 %v4117_v62  ;;  %2899 = vmatpush1.bf16.msra.mxu1 %v4132_v0 }
 0x50d   :  { %2869 = vmatprep.subr.bf16.mxu0 %v4121_v61  ;;  %2901 = vmatprep.subr.bf16.mxu1 %v4141_v5 }
 0x50e   :  { %1419 = vmatprep.mubr.f32.mxu0 %v4674_v56  ;;  %1490 = vmatprep.mubr.f32.mxu1 %v4674_v56 }
 0x510   :  { %2871 = vmatpush1.bf16.msra.mxu0 %v4137_v4  ;;  %2903 = vmatpush1.bf16.msra.mxu1 %v4152_v2 }
 0x511   :  { %2873 = vmatprep.subr.bf16.mxu0 %v4146_v3  ;;  %2905 = vmatprep.subr.bf16.mxu1 %v4157_v6 }
 0x514   :  { %2875 = vmatpush1.bf16.msra.mxu0 %v4162_v7  ;;  %2907 = vmatpush1.bf16.msra.mxu1 %v4172_v9 }
 0x515   :  { %2877 = vmatprep.subr.bf16.mxu0 %v4167_v8  ;;  %2909 = vmatprep.subr.bf16.mxu1 %v4177_v10 }
 0x518   :  { %2879 = vmatpush1.bf16.msra.mxu0 %v4182_v11  ;;  %2911 = vmatpush1.bf16.msra.mxu1 %v4192_v13 }
 0x519   :  { %2881 = vmatprep.subr.bf16.mxu0 %v4187_v12  ;;  %2913 = vmatprep.subr.bf16.mxu1 %v4197_v14 }
 0x51c   :  { %2883 = vmatpush1.bf16.msra.mxu0 %v4202_v15  ;;  %2915 = vmatpush1.bf16.msra.mxu1 %v4212_v17 }
 0x51d   :  { %2885 = vmatprep.subr.bf16.mxu0 %v4207_v16  ;;  %2917 = vmatprep.subr.bf16.mxu1 %v4217_v20 }
 0x520   :  { %2887 = vmatpush1.bf16.msra.mxu0 %v4222_v23  ;;  %2919 = vmatpush1.bf16.msra.mxu1 %v4232_v29 }
 0x521   :  { %2889 = vmatprep.subr.bf16.mxu0 %v4227_v26  ;;  %2921 = vmatprep.subr.bf16.mxu1 %v4237_v32 }
 0x524   :  { %2891 = vmatpush1.bf16.msra.mxu0 %v4242_v35  ;;  %2923 = vmatpush1.bf16.msra.mxu1 %v4252_v45 }
 0x525   :  { %2893 = vmatprep.subr.bf16.mxu0 %v4247_v38  ;;  %2925 = vmatprep.subr.bf16.mxu1 %v4257_v52 }
 0x528   :  { %2895 = vmatpush1.bf16.msra.mxu0 %v4262_v49  ;;  %2927 = vmatpush1.bf16.msra.mxu1 %v4268_v40 }
 0x529   :  { %2929 = vmatprep.subr.bf16.mxu0 %v4113_v63  ;;  %2961 = vmatprep.subr.bf16.mxu1 %v4128_v1 }
 0x5de   :  { %v1233_v50 = vpop.f32.mrb[10].mxu0  ;;  %v1304_v37 = vpop.f32.mrb[10].mxu1 }
 0x5df   :  { %v1313_v39 = vrot.slane %v1233_v50, 4  ;;  %v1235_v41 = vpop.f32.mrb[11].mxu0  ;;  %v1306_v58 = vpop.f32.mrb[11].mxu1  ;;  %v1315_v24 = vrot.slane %v1304_v37, 4 }
 0x5e0   :  { %v1314_v60 = vrot.slane %v1235_v41, 4  ;;  %v1316_v18 = vrot.slane %v1306_v58, 4  ;;  %v1345_v41 = vrot.slane %v4361_v30, 6 }
 0x5e1   :  { %v1321_v46 = vadd.f32 %v1313_v39, %v4095_v51  ;;  %v1323_v27 = vadd.f32 %v1315_v24, %v4097_v54 }
 0x5e2   :  { %v1322_v42 = vadd.f32 %v1314_v60, %v4099_v53  ;;  %v1324_v21 = vadd.f32 %v1316_v18, %v4101_v44 }
 0x5e3   :  { %v2433_v57 = vmul.f32 -1.442695, %v1321_v46 }
 0x5e4   :  { %v2434_v55 = vmul.f32 -1.442695, %v1322_v42  ;;  %v2435_v25 = vmul.f32 -1.442695, %v1324_v21  ;;  %v2278_v21 = vsel %vm2277_vm3, %v4318_v19, %v4364_v34 }
 0x5e5   :  { %3253 = vpow2.f32 %v2433_v57 }
 0x5e6   :  { %3255 = vpow2.f32 %v2434_v55 }
 0x5e7   :  { %3257 = vpow2.f32 %v2435_v25 }
 0x5e8   :  { %3259 = vtanh.f32 %v1323_v27 }
 0x5ef   :  { %v3254_v28 = vpop.eup %3253 }
 0x5f0   :  { %v3256_v22 = vpop.eup %3255  ;;  %v1328_v31 = vadd.f32 1.0, %v3254_v28 }
 0x5f1   :  { %v1334_v33 = vadd.f32 1.0, %v3256_v22  ;;  %v3258_v36 = vpop.eup %3257 }
 0x5f2   :  { %3261 = vrcp.f32 %v1328_v31  ;;  %v3260_v50 = vpop.eup %3259  ;;  %v1341_v46 = vadd.f32 1.0, %v3258_v36 }
 0x5f3   :  { %3263 = vrcp.f32 %v1334_v33 }
 0x5f4   :  { %3265 = vrcp.f32 %v1341_v46 }
 0x5fc   :  { %v3262_v39 = vpop.eup %3261 }
 0x5fd   :  { %v3264_v58 = vpop.eup %3263  ;;  %v1348_v60 = vmul.f32 %v3262_v39, %v3260_v50 }
 0x5fe   :  { %v1347_v37 = vmul.f32 %v3264_v58, %v1345_v41  ;;  %v3266_v57 = vpop.eup %3265 }
 0x600   :  { %v4406_v42 = vadd.f32 %v1348_v60, %v1347_v37 }
 0x602   :  { %3267 = vtanh.f32 %v4406_v42 }
 0x60c   :  { %v3268_v55 = vpop.eup %3267 }
 0x60d   :  { %v1351_v18 = vmul.f32 %v3268_v55, %v3266_v57 }
 0x60f   :  { %v1353_v24 = vrot.slane %v1351_v18, 4  ;;  %v4413_v30 = vsel %vm2279_vm4, %v2278_v21, %v1351_v18 }
 0x611   :  { %1420 = vmatmul.mubr.f32.vlgmr.msra.gmra.mrb[12].mxu0 %v1353_v24  ;;  %1491 = vmatmul.mubr.f32.vlgmr.msra.gmra.mrb[12].mxu1 %v1353_v24  ;;  %v1533_v24 = vrot.slane %v4406_v42, 6 }
 0x612   :  { %2931 = vmatpush1.bf16.msra.mxu0 %v4117_v62  ;;  %2963 = vmatpush1.bf16.msra.mxu1 %v4132_v0 }
 0x613   :  { %2933 = vmatprep.subr.bf16.mxu0 %v4121_v61  ;;  %2965 = vmatprep.subr.bf16.mxu1 %v4141_v5 }
 0x614   :  { %1607 = vmatprep.mubr.f32.mxu0 %v4674_v56  ;;  %1678 = vmatprep.mubr.f32.mxu1 %v4674_v56 }
 0x616   :  { %2935 = vmatpush1.bf16.msra.mxu0 %v4137_v4  ;;  %2967 = vmatpush1.bf16.msra.mxu1 %v4152_v2 }
 0x617   :  { %2937 = vmatprep.subr.bf16.mxu0 %v4146_v3  ;;  %2969 = vmatprep.subr.bf16.mxu1 %v4157_v6 }
 0x61a   :  { %2939 = vmatpush1.bf16.msra.mxu0 %v4162_v7  ;;  %2971 = vmatpush1.bf16.msra.mxu1 %v4172_v9 }
 0x61b   :  { %2941 = vmatprep.subr.bf16.mxu0 %v4167_v8  ;;  %2973 = vmatprep.subr.bf16.mxu1 %v4177_v10 }
 0x61e   :  { %2943 = vmatpush1.bf16.msra.mxu0 %v4182_v11  ;;  %2975 = vmatpush1.bf16.msra.mxu1 %v4192_v13 }
 0x61f   :  { %2945 = vmatprep.subr.bf16.mxu0 %v4187_v12  ;;  %2977 = vmatprep.subr.bf16.mxu1 %v4197_v14 }
 0x622   :  { %2947 = vmatpush1.bf16.msra.mxu0 %v4202_v15  ;;  %2979 = vmatpush1.bf16.msra.mxu1 %v4212_v17 }
 0x623   :  { %2949 = vmatprep.subr.bf16.mxu0 %v4207_v16  ;;  %2981 = vmatprep.subr.bf16.mxu1 %v4217_v20 }
 0x626   :  { %2951 = vmatpush1.bf16.msra.mxu0 %v4222_v23  ;;  %2983 = vmatpush1.bf16.msra.mxu1 %v4232_v29 }
 0x627   :  { %2953 = vmatprep.subr.bf16.mxu0 %v4227_v26  ;;  %2985 = vmatprep.subr.bf16.mxu1 %v4237_v32 }
 0x62a   :  { %2955 = vmatpush1.bf16.msra.mxu0 %v4242_v35  ;;  %2987 = vmatpush1.bf16.msra.mxu1 %v4252_v45 }
 0x62b   :  { %2957 = vmatprep.subr.bf16.mxu0 %v4247_v38  ;;  %2989 = vmatprep.subr.bf16.mxu1 %v4257_v52 }
 0x62e   :  { %2959 = vmatpush1.bf16.msra.mxu0 %v4262_v49  ;;  %2991 = vmatpush1.bf16.msra.mxu1 %v4268_v40 }
 0x62f   :  { %2993 = vmatprep.subr.bf16.mxu0 %v4113_v63  ;;  %3025 = vmatprep.subr.bf16.mxu1 %v4128_v1 }
 0x6e4   :  { %v1421_v19 = vpop.f32.mrb[12].mxu0  ;;  %v1492_v34 = vpop.f32.mrb[12].mxu1 }
 0x6e5   :  { %v1501_v25 = vrot.slane %v1421_v19, 2  ;;  %v1423_v27 = vpop.f32.mrb[13].mxu0  ;;  %v1494_v28 = vpop.f32.mrb[13].mxu1  ;;  %v1503_v58 = vrot.slane %v1492_v34, 2 }
 0x6e6   :  { %v1502_v22 = vrot.slane %v1423_v27, 2  ;;  %v1504_v39 = vrot.slane %v1494_v28, 2 }
 0x6e7   :  { %v1509_v31 = vadd.f32 %v1501_v25, %v4095_v51  ;;  %v1511_v46 = vadd.f32 %v1503_v58, %v4097_v54 }
 0x6e8   :  { %v1510_v33 = vadd.f32 %v1502_v22, %v4099_v53  ;;  %v1512_v41 = vadd.f32 %v1504_v39, %v4101_v44 }
 0x6e9   :  { %v2436_v36 = vmul.f32 -1.442695, %v1509_v31 }
 0x6ea   :  { %v2437_v50 = vmul.f32 -1.442695, %v1510_v33  ;;  %v2438_v60 = vmul.f32 -1.442695, %v1512_v41 }
 0x6eb   :  { %3269 = vpow2.f32 %v2436_v36 }
 0x6ec   :  { %3271 = vpow2.f32 %v2437_v50 }
 0x6ed   :  { %3273 = vpow2.f32 %v2438_v60 }
 0x6ee   :  { %3275 = vtanh.f32 %v1511_v46 }
 0x6f5   :  { %v3270_v37 = vpop.eup %3269 }
 0x6f6   :  { %v3272_v57 = vpop.eup %3271  ;;  %v1516_v55 = vadd.f32 1.0, %v3270_v37 }
 0x6f7   :  { %v1522_v18 = vadd.f32 1.0, %v3272_v57  ;;  %v3274_v51 = vpop.eup %3273 }
 0x6f8   :  { %3277 = vrcp.f32 %v1516_v55  ;;  %v3276_v53 = vpop.eup %3275  ;;  %v1529_v44 = vadd.f32 1.0, %v3274_v51 }
 0x6f9   :  { %3279 = vrcp.f32 %v1522_v18 }
 0x6fa   :  { %3281 = vrcp.f32 %v1529_v44 }
 0x702   :  { %v3278_v21 = vpop.eup %3277 }
 0x703   :  { %v3280_v19 = vpop.eup %3279  ;;  %v1536_v25 = vmul.f32 %v3278_v21, %v3276_v53 }
 0x704   :  { %v1535_v34 = vmul.f32 %v3280_v19, %v1533_v24  ;;  %v3282_v54 = vpop.eup %3281 }
 0x706   :  { %v4454_v27 = vadd.f32 %v1536_v25, %v1535_v34 }
 0x708   :  { %3283 = vtanh.f32 %v4454_v27  ;;  %v1709_v25 = vrot.slane %v4454_v27, 6 }
 0x712   :  { %v3284_v28 = vpop.eup %3283 }
 0x713   :  { %v1539_v22 = vmul.f32 %v3284_v28, %v3282_v54 }
 0x715   :  { %v1541_v31 = vrot.slane %v1539_v22, 6  ;;  %v4459_v33 = vsel %vm2281_vm5, %v4413_v30, %v1539_v22 }
 0x717   :  { %1608 = vmatmul.mubr.f32.vlgmr.msra.gmra.mrb[14].mxu0 %v1541_v31  ;;  %1679 = vmatmul.mubr.f32.vlgmr.msra.gmra.mrb[14].mxu1 %v1541_v31 }
 0x718   :  { %2995 = vmatpush1.bf16.msra.mxu0 %v4117_v62  ;;  %3027 = vmatpush1.bf16.msra.mxu1 %v4132_v0 }
 0x719   :  { %2997 = vmatprep.subr.bf16.mxu0 %v4121_v61  ;;  %3029 = vmatprep.subr.bf16.mxu1 %v4141_v5 }
 0x71a   :  { %1780 = vmatprep.mubr.f32.mxu0 %v4674_v56  ;;  %1851 = vmatprep.mubr.f32.mxu1 %v4674_v56 }
 0x71c   :  { %2999 = vmatpush1.bf16.msra.mxu0 %v4137_v4  ;;  %3031 = vmatpush1.bf16.msra.mxu1 %v4152_v2 }
 0x71d   :  { %3001 = vmatprep.subr.bf16.mxu0 %v4146_v3  ;;  %3033 = vmatprep.subr.bf16.mxu1 %v4157_v6 }
 0x720   :  { %3003 = vmatpush1.bf16.msra.mxu0 %v4162_v7  ;;  %3035 = vmatpush1.bf16.msra.mxu1 %v4172_v9 }
 0x721   :  { %3005 = vmatprep.subr.bf16.mxu0 %v4167_v8  ;;  %3037 = vmatprep.subr.bf16.mxu1 %v4177_v10 }
 0x724   :  { %3007 = vmatpush1.bf16.msra.mxu0 %v4182_v11  ;;  %3039 = vmatpush1.bf16.msra.mxu1 %v4192_v13 }
 0x725   :  { %3009 = vmatprep.subr.bf16.mxu0 %v4187_v12  ;;  %3041 = vmatprep.subr.bf16.mxu1 %v4197_v14 }
 0x728   :  { %3011 = vmatpush1.bf16.msra.mxu0 %v4202_v15  ;;  %3043 = vmatpush1.bf16.msra.mxu1 %v4212_v17 }
 0x729   :  { %3013 = vmatprep.subr.bf16.mxu0 %v4207_v16  ;;  %3045 = vmatprep.subr.bf16.mxu1 %v4217_v20 }
 0x72c   :  { %3015 = vmatpush1.bf16.msra.mxu0 %v4222_v23  ;;  %3047 = vmatpush1.bf16.msra.mxu1 %v4232_v29 }
 0x72d   :  { %3017 = vmatprep.subr.bf16.mxu0 %v4227_v26  ;;  %3049 = vmatprep.subr.bf16.mxu1 %v4237_v32 }
 0x730   :  { %3019 = vmatpush1.bf16.msra.mxu0 %v4242_v35  ;;  %3051 = vmatpush1.bf16.msra.mxu1 %v4252_v45 }
 0x731   :  { %3021 = vmatprep.subr.bf16.mxu0 %v4247_v38  ;;  %3053 = vmatprep.subr.bf16.mxu1 %v4257_v52 }
 0x734   :  { %3023 = vmatpush1.bf16.msra.mxu0 %v4262_v49  ;;  %3055 = vmatpush1.bf16.msra.mxu1 %v4268_v40 }
 0x735   :  { %3057 = vmatprep.subr.bf16.mxu0 %v4113_v63  ;;  %3089 = vmatprep.subr.bf16.mxu1 %v4128_v1 }
 0x7ea   :  { %v1609_v42 = vpop.f32.mrb[14].mxu0  ;;  %v1680_v30 = vpop.f32.mrb[14].mxu1 }
 0x7eb   :  { %v1685_v36 = vadd.f32 %v1609_v42, %v4103_v47  ;;  %v1611_v50 = vpop.f32.mrb[15].mxu0  ;;  %v1682_v39 = vpop.f32.mrb[15].mxu1  ;;  %v1687_v57 = vadd.f32 %v1680_v30, %v4105_v59 }
 0x7ec   :  { %v1686_v41 = vadd.f32 %v1611_v50, %v4107_v43  ;;  %v1688_v46 = vadd.f32 %v1682_v39, %v4109_v48 }
 0x7ed   :  { %v2439_v58 = vmul.f32 -1.442695, %v1685_v36 }
 0x7ee   :  { %v2440_v60 = vmul.f32 -1.442695, %v1686_v41  ;;  %v2441_v37 = vmul.f32 -1.442695, %v1688_v46 }
 0x7ef   :  { %3285 = vpow2.f32 %v2439_v58 }
 0x7f0   :  { %3287 = vpow2.f32 %v2440_v60 }
 0x7f1   :  { %3289 = vpow2.f32 %v2441_v37 }
 0x7f2   :  { %3291 = vtanh.f32 %v1687_v57 }
 0x7f9   :  { %v3286_v55 = vpop.eup %3285 }
 0x7fa   :  { %v3288_v18 = vpop.eup %3287  ;;  %v1692_v51 = vadd.f32 1.0, %v3286_v55 }
 0x7fb   :  { %v1698_v53 = vadd.f32 1.0, %v3288_v18  ;;  %v3290_v21 = vpop.eup %3289 }
 0x7fc   :  { %3293 = vrcp.f32 %v1692_v51  ;;  %v3292_v24 = vpop.eup %3291  ;;  %v1705_v54 = vadd.f32 1.0, %v3290_v21 }
 0x7fd   :  { %3295 = vrcp.f32 %v1698_v53 }
 0x7fe   :  { %3297 = vrcp.f32 %v1705_v54 }
 0x806   :  { %v3294_v19 = vpop.eup %3293 }
 0x807   :  { %v3296_v44 = vpop.eup %3295  ;;  %v1712_v34 = vmul.f32 %v3294_v19, %v3292_v24 }
 0x808   :  { %v1711_v28 = vmul.f32 %v3296_v44, %v1709_v25  ;;  %v3298_v31 = vpop.eup %3297 }
 0x80a   :  { %v4500_v22 = vadd.f32 %v1712_v34, %v1711_v28 }
 0x80c   :  { %3299 = vtanh.f32 %v4500_v22  ;;  %v1894_v54 = vrot.slane %v4500_v22, 6 }
 0x816   :  { %v3300_v42 = vpop.eup %3299 }
 0x817   :  { %v4503_v30 = vmul.f32 %v3300_v42, %v3298_v31 }
 0x819   :  { %1781 = vmatmul.mubr.f32.vlgmr.msra.gmra.mrb[16].mxu0 %v4503_v30  ;;  %1852 = vmatmul.mubr.f32.vlgmr.msra.gmra.mrb[16].mxu1 %v4503_v30 }
 0x81a   :  { %3059 = vmatpush1.bf16.msra.mxu0 %v4117_v62  ;;  %3091 = vmatpush1.bf16.msra.mxu1 %v4132_v0 }
 0x81b   :  { %3061 = vmatprep.subr.bf16.mxu0 %v4121_v61  ;;  %3093 = vmatprep.subr.bf16.mxu1 %v4141_v5 }
 0x81c   :  { %1968 = vmatprep.mubr.f32.mxu0 %v4674_v56  ;;  %2039 = vmatprep.mubr.f32.mxu1 %v4674_v56 }
 0x81e   :  { %3063 = vmatpush1.bf16.msra.mxu0 %v4137_v4  ;;  %3095 = vmatpush1.bf16.msra.mxu1 %v4152_v2 }
 0x81f   :  { %3065 = vmatprep.subr.bf16.mxu0 %v4146_v3  ;;  %3097 = vmatprep.subr.bf16.mxu1 %v4157_v6 }
 0x822   :  { %3067 = vmatpush1.bf16.msra.mxu0 %v4162_v7  ;;  %3099 = vmatpush1.bf16.msra.mxu1 %v4172_v9 }
 0x823   :  { %3069 = vmatprep.subr.bf16.mxu0 %v4167_v8  ;;  %3101 = vmatprep.subr.bf16.mxu1 %v4177_v10 }
 0x826   :  { %3071 = vmatpush1.bf16.msra.mxu0 %v4182_v11  ;;  %3103 = vmatpush1.bf16.msra.mxu1 %v4192_v13 }
 0x827   :  { %3073 = vmatprep.subr.bf16.mxu0 %v4187_v12  ;;  %3105 = vmatprep.subr.bf16.mxu1 %v4197_v14 }
 0x82a   :  { %3075 = vmatpush1.bf16.msra.mxu0 %v4202_v15  ;;  %3107 = vmatpush1.bf16.msra.mxu1 %v4212_v17 }
 0x82b   :  { %3077 = vmatprep.subr.bf16.mxu0 %v4207_v16  ;;  %3109 = vmatprep.subr.bf16.mxu1 %v4217_v20 }
 0x82e   :  { %3079 = vmatpush1.bf16.msra.mxu0 %v4222_v23  ;;  %3111 = vmatpush1.bf16.msra.mxu1 %v4232_v29 }
 0x82f   :  { %3081 = vmatprep.subr.bf16.mxu0 %v4227_v26  ;;  %3113 = vmatprep.subr.bf16.mxu1 %v4237_v32 }
 0x832   :  { %3083 = vmatpush1.bf16.msra.mxu0 %v4242_v35  ;;  %3115 = vmatpush1.bf16.msra.mxu1 %v4252_v45 }
 0x833   :  { %3085 = vmatprep.subr.bf16.mxu0 %v4247_v38  ;;  %3117 = vmatprep.subr.bf16.mxu1 %v4257_v52 }
 0x836   :  { %3087 = vmatpush1.bf16.msra.mxu0 %v4262_v49  ;;  %3119 = vmatpush1.bf16.msra.mxu1 %v4268_v40 }
 0x837   :  { %3121 = vmatprep.subr.bf16.mxu0 %v4113_v63  ;;  %3153 = vmatprep.subr.bf16.mxu1 %v4128_v1 }
 0x8ec   :  { %v1782_v27 = vpop.f32.mrb[16].mxu0  ;;  %v1853_v36 = vpop.f32.mrb[16].mxu1 }
 0x8ed   :  { %v1862_v50 = vrot.slane %v1782_v27, 6  ;;  %v1784_v39 = vpop.f32.mrb[17].mxu0  ;;  %v1855_v41 = vpop.f32.mrb[17].mxu1  ;;  %v1864_v63 = vrot.slane %v1853_v36, 6 }
 0x8ee   :  { %v1863_v58 = vrot.slane %v1784_v39, 6  ;;  %v1865_v55 = vrot.slane %v1855_v41, 6 }
 0x8ef   :  { %v1870_v60 = vadd.f32 %v1862_v50, %v4103_v47  ;;  %v1872_v1 = vadd.f32 %v1864_v63, %v4105_v59 }
 0x8f0   :  { %v1871_v46 = vadd.f32 %v1863_v58, %v4107_v43  ;;  %v1873_v18 = vadd.f32 %v1865_v55, %v4109_v48 }
 0x8f1   :  { %v2442_v37 = vmul.f32 -1.442695, %v1870_v60 }
 0x8f2   :  { %v2443_v57 = vmul.f32 -1.442695, %v1871_v46  ;;  %v2444_v51 = vmul.f32 -1.442695, %v1873_v18 }
 0x8f3   :  { %3301 = vpow2.f32 %v2442_v37 }
 0x8f4   :  { %3303 = vpow2.f32 %v2443_v57 }
 0x8f5   :  { %3305 = vpow2.f32 %v2444_v51 }
 0x8f6   :  { %3307 = vtanh.f32 %v1872_v1 }
 0x8fd   :  { %v3302_v53 = vpop.eup %3301 }
 0x8fe   :  { %v3304_v21 = vpop.eup %3303  ;;  %v1877_v24 = vadd.f32 1.0, %v3302_v53 }
 0x8ff   :  { %v1883_v19 = vadd.f32 1.0, %v3304_v21  ;;  %v3306_v25 = vpop.eup %3305 }
 0x900   :  { %3309 = vrcp.f32 %v1877_v24  ;;  %v3308_v44 = vpop.eup %3307  ;;  %v1890_v42 = vadd.f32 1.0, %v3306_v25 }
 0x901   :  { %3311 = vrcp.f32 %v1883_v19 }
 0x902   :  { %3313 = vrcp.f32 %v1890_v42 }
 0x90a   :  { %v3310_v34 = vpop.eup %3309 }
 0x90b   :  { %v3312_v28 = vpop.eup %3311  ;;  %v1897_v31 = vmul.f32 %v3310_v34, %v3308_v44 }
 0x90c   :  { %v1896_v27 = vmul.f32 %v3312_v28, %v1894_v54  ;;  %v3314_v50 = vpop.eup %3313 }
 0x90e   :  { %v4546_v36 = vadd.f32 %v1897_v31, %v1896_v27 }
 0x910   :  { %3315 = vtanh.f32 %v4546_v36 }
 0x91a   :  { %v3316_v39 = vpop.eup %3315 }
 0x91b   :  { %v4549_v41 = vmul.f32 %v3316_v39, %v3314_v50 }
 0x91d   :  { %v1902_v58 = vrot.slane %v4549_v41, 2  ;;  %v2283_v22 = vsel %vm2277_vm3, %v4503_v30, %v4549_v41 }
 0x91f   :  { %1969 = vmatmul.mubr.f32.vlgmr.msra.gmra.mrb[18].mxu0 %v1902_v58  ;;  %2040 = vmatmul.mubr.f32.vlgmr.msra.gmra.mrb[18].mxu1 %v1902_v58 }
 0x920   :  { %3123 = vmatpush1.bf16.msra.mxu0 %v4117_v62  ;;  %3155 = vmatpush1.bf16.msra.mxu1 %v4132_v0 }
 0x921   :  { %3125 = vmatprep.subr.bf16.mxu0 %v4121_v61  ;;  %3157 = vmatprep.subr.bf16.mxu1 %v4141_v5 }
 0x922   :  { %2156 = vmatprep.mubr.f32.mxu0 %v4674_v56  ;;  %2227 = vmatprep.mubr.f32.mxu1 %v4674_v56 }
 0x924   :  { %3127 = vmatpush1.bf16.msra.mxu0 %v4137_v4  ;;  %3159 = vmatpush1.bf16.msra.mxu1 %v4152_v2 }
 0x925   :  { %3129 = vmatprep.subr.bf16.mxu0 %v4146_v3  ;;  %3161 = vmatprep.subr.bf16.mxu1 %v4157_v6 }
 0x928   :  { %3131 = vmatpush1.bf16.msra.mxu0 %v4162_v7  ;;  %3163 = vmatpush1.bf16.msra.mxu1 %v4172_v9 }
 0x929   :  { %3133 = vmatprep.subr.bf16.mxu0 %v4167_v8  ;;  %3165 = vmatprep.subr.bf16.mxu1 %v4177_v10 }
 0x92c   :  { %3135 = vmatpush1.bf16.msra.mxu0 %v4182_v11  ;;  %3167 = vmatpush1.bf16.msra.mxu1 %v4192_v13 }
 0x92d   :  { %3137 = vmatprep.subr.bf16.mxu0 %v4187_v12  ;;  %3169 = vmatprep.subr.bf16.mxu1 %v4197_v14 }
 0x930   :  { %3139 = vmatpush1.bf16.msra.mxu0 %v4202_v15  ;;  %3171 = vmatpush1.bf16.msra.mxu1 %v4212_v17 }
 0x931   :  { %3141 = vmatprep.subr.bf16.mxu0 %v4207_v16  ;;  %3173 = vmatprep.subr.bf16.mxu1 %v4217_v20 }
 0x934   :  { %3143 = vmatpush1.bf16.msra.mxu0 %v4222_v23  ;;  %3175 = vmatpush1.bf16.msra.mxu1 %v4232_v29 }
 0x935   :  { %3145 = vmatprep.subr.bf16.mxu0 %v4227_v26  ;;  %3177 = vmatprep.subr.bf16.mxu1 %v4237_v32  ;;  %v2082_v26 = vrot.slane %v4546_v36, 6 }
 0x938   :  { %3147 = vmatpush1.bf16.msra.mxu0 %v4242_v35  ;;  %3179 = vmatpush1.bf16.msra.mxu1 %v4252_v45 }
 0x939   :  { %3149 = vmatprep.subr.bf16.mxu0 %v4247_v38  ;;  %3181 = vmatprep.subr.bf16.mxu1 %v4257_v52 }
 0x93c   :  { %3151 = vmatpush1.bf16.msra.mxu0 %v4262_v49  ;;  %3183 = vmatpush1.bf16.msra.mxu1 %v4268_v40 }
 0x9f2   :  { %v1970_v56 = vpop.f32.mrb[18].mxu0  ;;  %v2041_v62 = vpop.f32.mrb[18].mxu1 }
 0x9f3   :  { %v2050_v61 = vrot.slane %v1970_v56, 4  ;;  %v1972_v0 = vpop.f32.mrb[19].mxu0  ;;  %v2043_v4 = vpop.f32.mrb[19].mxu1  ;;  %v2052_v10 = vrot.slane %v2041_v62, 4 }
 0x9f4   :  { %v2051_v5 = vrot.slane %v1972_v0, 4  ;;  %v2053_v8 = vrot.slane %v2043_v4, 4  ;;  %v4697_v0 = vld [vmem:[#allocation31_spill] sm:$0xff]  ;;  %v4698_v4 = vld [vmem:[#allocation32_spill] sm:$0xff] }
 0x9f5   :  { %v2058_v3 = vadd.f32 %v2050_v61, %v4103_v47  ;;  %v2060_v12 = vadd.f32 %v2052_v10, %v4105_v59 }
 0x9f6   :  { %v2059_v2 = vadd.f32 %v2051_v5, %v4107_v43  ;;  %v2061_v9 = vadd.f32 %v2053_v8, %v4109_v48  ;;  %v3184_v5 = vpack.c.bf16 %v4698_v4, %v4697_v0 }
 0x9f7   :  { %v2445_v6 = vmul.f32 -1.442695, %v2058_v3  ;;  %v4699_v3 = vld [vmem:[#allocation33_spill] sm:$0xff] }
 0x9f8   :  { %v2446_v7 = vmul.f32 -1.442695, %v2059_v2  ;;  %v2447_v11 = vmul.f32 -1.442695, %v2061_v9  ;;  %v4700_v2 = vld [vmem:[#allocation34_spill] sm:$0xff] }
 0x9f9   :  { %3317 = vpow2.f32 %v2445_v6  ;;  %v3188_v6 = vpack.c.bf16 %v4700_v2, %v4699_v3 }
 0x9fa   :  { %3319 = vpow2.f32 %v2446_v7 }
 0x9fb   :  { %3321 = vpow2.f32 %v2447_v11 }
 0x9fc   :  { %3323 = vtanh.f32 %v2060_v12 }
 0xa03   :  { %v3318_v13 = vpop.eup %3317 }
 0xa04   :  { %v3320_v14 = vpop.eup %3319  ;;  %v2065_v15 = vadd.f32 1.0, %v3318_v13 }
 0xa05   :  { %v2071_v16 = vadd.f32 1.0, %v3320_v14  ;;  %v3322_v17 = vpop.eup %3321 }
 0xa06   :  { %3325 = vrcp.f32 %v2065_v15  ;;  %v3324_v20 = vpop.eup %3323  ;;  %v2078_v35 = vadd.f32 1.0, %v3322_v17 }
 0xa07   :  { %3327 = vrcp.f32 %v2071_v16 }
 0xa08   :  { %3329 = vrcp.f32 %v2078_v35 }
 0xa10   :  { %v3326_v23 = vpop.eup %3325 }
 0xa11   :  { %v3328_v29 = vpop.eup %3327  ;;  %v2085_v32 = vmul.f32 %v3326_v23, %v3324_v20 }
 0xa12   :  { %v2084_v38 = vmul.f32 %v3328_v29, %v2082_v26  ;;  %v3330_v52 = vpop.eup %3329 }
 0xa14   :  { %v2086_v45 = vadd.f32 %v2085_v32, %v2084_v38 }
 0xa16   :  { %3331 = vtanh.f32 %v2086_v45  ;;  %v2270_v36 = vrot.slane %v2086_v45, 6 }
 0xa20   :  { %v3332_v49 = vpop.eup %3331 }
 0xa21   :  { %v2088_v40 = vmul.f32 %v3332_v49, %v3330_v52 }
 0xa23   :  { %v2090_v60 = vrot.slane %v2088_v40, 4  ;;  %v2284_v46 = vsel %vm2279_vm4, %v2283_v22, %v2088_v40 }
 0xa25   :  { %2157 = vmatmul.mubr.f32.vlgmr.msra.gmra.mrb[20].mxu0 %v2090_v60  ;;  %2228 = vmatmul.mubr.f32.vlgmr.msra.gmra.mrb[20].mxu1 %v2090_v60 }
 0xa26   :  { %2573 = vmatprep.mubr.f32.mxu0 %v4459_v33 }
 0xaf8   :  { %v2158_v37 = vpop.f32.mrb[20].mxu0  ;;  %v2229_v57 = vpop.f32.mrb[20].mxu1 }
 0xaf9   :  { %v2238_v55 = vrot.slane %v2158_v37, 2  ;;  %v2160_v18 = vpop.f32.mrb[21].mxu0  ;;  %v2231_v63 = vpop.f32.mrb[21].mxu1  ;;  %v2240_v25 = vrot.slane %v2229_v57, 2 }
 0xafa   :  { %v2239_v51 = vrot.slane %v2160_v18, 2  ;;  %v2241_v19 = vrot.slane %v2231_v63, 2 }
 0xafb   :  { %v2246_v1 = vadd.f32 %v2238_v55, %v4103_v47  ;;  %v2248_v34 = vadd.f32 %v2240_v25, %v4105_v59 }
 0xafc   :  { %v2247_v53 = vadd.f32 %v2239_v51, %v4107_v43  ;;  %v2249_v30 = vadd.f32 %v2241_v19, %v4109_v48 }
 0xafd   :  { %v2448_v21 = vmul.f32 -1.442695, %v2246_v1 }
 0xafe   :  { %v2449_v24 = vmul.f32 -1.442695, %v2247_v53  ;;  %v2450_v44 = vmul.f32 -1.442695, %v2249_v30 }
 0xaff   :  { %3333 = vpow2.f32 %v2448_v21 }
 0xb00   :  { %3335 = vpow2.f32 %v2449_v24 }
 0xb01   :  { %3337 = vpow2.f32 %v2450_v44 }
 0xb02   :  { %3339 = vtanh.f32 %v2248_v34 }
 0xb09   :  { %v3334_v54 = vpop.eup %3333 }
 0xb0a   :  { %v3336_v28 = vpop.eup %3335  ;;  %v2253_v31 = vadd.f32 1.0, %v3334_v54 }
 0xb0b   :  { %v2259_v42 = vadd.f32 1.0, %v3336_v28  ;;  %v3338_v47 = vpop.eup %3337 }
 0xb0c   :  { %3341 = vrcp.f32 %v2253_v31  ;;  %v3340_v43 = vpop.eup %3339  ;;  %v2266_v41 = vadd.f32 1.0, %v3338_v47 }
 0xb0d   :  { %3343 = vrcp.f32 %v2259_v42 }
 0xb0e   :  { %3345 = vrcp.f32 %v2266_v41 }
 0xb16   :  { %v3342_v27 = vpop.eup %3341 }
 0xb17   :  { %v3344_v50 = vpop.eup %3343  ;;  %v2273_v39 = vmul.f32 %v3342_v27, %v3340_v43 }
 0xb18   :  { %v2272_v48 = vmul.f32 %v3344_v50, %v2270_v36  ;;  %v3346_v59 = vpop.eup %3345 }
 0xb1a   :  { %v2274_v58 = vadd.f32 %v2273_v39, %v2272_v48 }
 0xb1c   :  { %3347 = vtanh.f32 %v2274_v58 }
 0xb26   :  { %v3348_v56 = vpop.eup %3347 }
 0xb27   :  { %v2276_v62 = vmul.f32 %v3348_v56, %v3346_v59 }
 0xb29   :  { %v2285_v61 = vsel %vm2281_vm5, %v2284_v46, %v2276_v62 }
 0xb2a   :  { %3351 = dma.done.wait [#allocation4 + $0x1], 2048 }
 0xb2b   :  { %3352 = vsyncadd [#allocation4 + $0x1], 4294965248  ;;  %3185 = vmatprep.subr.bf16.mxu0 %v3184_v5  ;;  %v4701_v7 = vld [vmem:[#allocation35_spill] sm:$0xff]  ;;  %v4702_v8 = vld [vmem:[#allocation36_spill] sm:$0xff] }
 0xb2c   :  { %3187 = vmatpush3.bf16.msra.mxu0 %v3184_v5  ;;  %v3192_v9 = vpack.c.bf16 %v4702_v8, %v4701_v7  ;;  %v4703_v10 = vld [vmem:[#allocation37_spill] sm:$0xff]  ;;  %v4704_v11 = vld [vmem:[#allocation38_spill] sm:$0xff]  ;;  %v4705_v13 = vld [vmem:[#allocation39_spill] sm:$0xff] }
 0xb2d   :  { %3189 = vmatprep.subr.bf16.mxu0 %v3188_v6  ;;  %v3196_v12 = vpack.c.bf16 %v4704_v11, %v4703_v10  ;;  %v4706_v14 = vld [vmem:[#allocation40_spill] sm:$0xff]  ;;  %v4707_v33 = vld [vmem:[#allocation41_spill] sm:$0xff]  ;;  %v4708_v16 = vld [vmem:[#allocation42_spill] sm:$0xff] }
 0xb2e   :  { %v3200_v15 = vpack.c.bf16 %v4706_v14, %v4705_v13  ;;  %v3204_v17 = vpack.c.bf16 %v4708_v16, %v4707_v33  ;;  %v4709_v20 = vld [vmem:[#allocation43_spill] sm:$0xff]  ;;  %v4710_v23 = vld [vmem:[#allocation44_spill] sm:$0xff]  ;;  %v4711_v29 = vld [vmem:[#allocation45_spill] sm:$0xff] }
 0xb2f   :  { %v3208_v26 = vpack.c.bf16 %v4710_v23, %v4709_v20  ;;  %v4712_v32 = vld [vmem:[#allocation46_spill] sm:$0xff]  ;;  %v2451_v38 = vld [vmem:[%s4630_s6] ss:$0 sm:$0xff] }
 0xb30   :  { %3191 = vmatpush3.bf16.msra.mxu0 %v3188_v6  ;;  %v3212_v35 = vpack.c.bf16 %v4712_v32, %v4711_v29 }
 0xb31   :  { %3193 = vmatprep.subr.bf16.mxu0 %v3192_v9 }
 0xb34   :  { %3195 = vmatpush3.bf16.msra.mxu0 %v3192_v9 }
 0xb35   :  { %3197 = vmatprep.subr.bf16.mxu0 %v3196_v12 }
 0xb38   :  { %3199 = vmatpush3.bf16.msra.mxu0 %v3196_v12 }
 0xb39   :  { %3201 = vmatprep.subr.bf16.mxu0 %v3200_v15 }
 0xb3c   :  { %3203 = vmatpush3.bf16.msra.mxu0 %v3200_v15 }
 0xb3d   :  { %3205 = vmatprep.subr.bf16.mxu0 %v3204_v17 }
 0xb40   :  { %3207 = vmatpush3.bf16.msra.mxu0 %v3204_v17 }
 0xb41   :  { %3209 = vmatprep.subr.bf16.mxu0 %v3208_v26 }
 0xb44   :  { %3211 = vmatpush3.bf16.msra.mxu0 %v3208_v26 }
 0xb45   :  { %3213 = vmatprep.subr.bf16.mxu0 %v3212_v35 }
 0xb48   :  { %3215 = vmatpush3.bf16.msra.mxu0 %v3212_v35 }
 0xb4b   :  { %2574 = vmatmul.mubr.f32.vlgmr.msra.gmra.mrb[22].mxu0 %v2285_v61 }
 0xc1e   :  { %v2575_v45 = vpop.f32.mrb[22].mxu0 }
 0xc1f   :  { %v2384_v52 = vadd.f32 %v2575_v45, %v2451_v38  ;;  %v2378_v49 = vpop.f32.mrb[23].mxu0 }
 0xc20   :  { %v2379_v40 = vadd.f32 %v2451_v38, %v2378_v49 }
 0xc21   :  { %2388 = vst [vmem:[%s4633_s9 + $0x8] sm:$0xff] %v2384_v52 }
 0xc22   :  { %2387 = vst [vmem:[%s4633_s9] sm:$0xff] %v2379_v40 }
 0xc23   :  { %2393 = vsyncmov [#allocation4] }
 0xc26   :  { %s2394_s23 = vpop.sfrf %2393 }
 0xc27   :  { %p2452_p0 = scmp.ne.s32.totalorder %s2394_s23, 0 }
 0xc29   :  { %2398 = shalt.err (%p2452_p0)  }
 0xc2a   :  { %2400 = vsyncmov [#allocation4 + $0x1] }
 0xc2d   :  { %s2401_s24 = vpop.sfrf %2400 }
 0xc2e   :  { %p2453_p1 = scmp.ne.s32.totalorder %s2401_s24, 0 }
 0xc30   :  { %2405 = shalt.err (%p2453_p1)  }

</bundles_post_ra>
